<compile_context>
chip_gen: v7x
topology: tpu7x:2x2x1
jax: 0.10.0
libtpu: 0.0.40
codegen_flags: <defaults>
</compile_context>

<pallas_src>
import jax
import jax.numpy as jnp
from jax.experimental import pallas as pl
from jax.experimental.pallas import tpu as pltpu

EPS = 1e-5        # PyTorch BatchNorm2d default eps
LANES = 128
SUBS = 16         # bf16 sublane tile: pad conv1 out-channels so the conv2
                  # patch blocks are stored vreg-aligned (no masked stores)


def _rup(n, m):
    return ((n + m - 1) // m) * m


def _vmem():
    return pl.BlockSpec(memory_space=pltpu.MemorySpace.VMEM)


# --------------------------- fused kernel ---------------------------

def _make_kernel(*, B, H, W, K, C1P, c2, nout, L, LP1, NP):
    """Fused conv1+BN+ReLU -> conv2+BN+ReLU -> Linear.

    Activation layout: (channels, B*H*W), column index = b*H*W + h*W + w.
    The full input grid is kept through both convs; columns whose (h, w) lie
    beyond the valid conv output are masked out of the BN statistics and meet
    only zero linear weights, so they never affect the result (and are always
    finite because the offline patch matrix is zero-padded).
    """
    OH1, OW1 = H - (K - 1), W - (K - 1)
    OH2, OW2 = OH1 - (K - 1), OW1 - (K - 1)
    Q = H * W
    inv_cnt1 = 1.0 / float(B * OH1 * OW1)
    inv_cnt2 = 1.0 / float(B * OH2 * OW2)

    def kernel(p1_ref, w1_ref, w2_ref, wl_ref, mask_ref, bn_ref, lin_ref,
               o_ref, p2_ref):
        f32 = jnp.float32

        # ---- conv1: ONE MXU matmul against the offline-built bf16 patch
        #      matrix (conv bias dropped: BN mean-subtraction cancels it).
        acc1 = jnp.dot(w1_ref[...], p1_ref[...],
                       preferred_element_type=f32)            # (C1P, LP1) f32

        # ---- BatchNorm1 (training mode, biased var over valid grid columns)
        m1 = mask_ref[0:1, :]                                 # (1, LP1) precomputed
        mu1 = jnp.sum(acc1 * m1, axis=1, keepdims=True) * inv_cnt1
        d1 = acc1 - mu1
        var1 = jnp.sum(d1 * d1 * m1, axis=1, keepdims=True) * inv_cnt1
        scale1 = jax.lax.rsqrt(var1 + EPS) * bn_ref[0:C1P, 0:1]
        y1 = jnp.maximum(d1 * scale1 + bn_ref[0:C1P, 1:2], 0.0)   # (C1P, LP1)
        # padded channel rows (>= real c1) are exactly zero by construction
        # (zero conv1 weight rows, zero gamma/beta).

        # ---- conv2 patch scratch: K*K lane-rolled copies of y1 (XLU roll,
        #      aligned 16-row bf16 block stores), then ONE matmul.
        for kh in range(K):
            for kw in range(K):
                s = kh * W + kw
                blk = y1 if s == 0 else pltpu.roll(y1, LP1 - s, 1)
                t = kh * K + kw
                p2_ref[t * C1P:(t + 1) * C1P, :] = blk[:, :L].astype(jnp.bfloat16)

        acc2 = jnp.dot(w2_ref[...], p2_ref[...],
                       preferred_element_type=f32)            # (c2, L) f32

        # ---- BatchNorm2 + ReLU (reassociated affine: one mul + one add pass)
        m2 = mask_ref[1:2, :L]
        mu2 = jnp.sum(acc2 * m2, axis=1, keepdims=True) * inv_cnt2
        d2 = acc2 - mu2
        var2 = jnp.sum(d2 * d2 * m2, axis=1, keepdims=True) * inv_cnt2
        scale2 = jax.lax.rsqrt(var2 + EPS) * bn_ref[0:c2, 2:3]
        y2 = jnp.maximum(d2 * scale2 + bn_ref[0:c2, 3:4], 0.0)    # (c2, L) f32

        # ---- Linear: torch NCHW flatten folded into a batch-tiled weight
        #      (zeros at invalid grid columns).  f32 VPU multiply + reduces,
        #      precomputed one-hot rows, one lane-dense store per batch row.
        bias_row = lin_ref[0:1, :]                            # (1, NP)
        rows = [bias_row] * B
        for o in range(nout):
            prod = y2 * wl_ref[o]                             # (c2, L)
            colsum = jnp.sum(prod, axis=0, keepdims=True)     # (1, L) sublane reduce
            oh = lin_ref[1 + o:2 + o, :]                      # (1, NP) one-hot
            for b in range(B):
                v = jnp.sum(colsum[:, b * Q:(b + 1) * Q], axis=1, keepdims=True)
                rows[b] = rows[b] + v * oh
        for b in range(B):
            o_ref[pl.ds(b, 1), :] = rows[b]

    return kernel


# --------------------------- JAX wrapper ---------------------------

def forward(kparams, x):
    """Fused forward pass.  x: (B, Cin, H, W) float32, kparams from prepare_params."""
    B, cin, H, W = x.shape
    w1p, w2p, wlt = kparams["w1"], kparams["w2"], kparams["wl"]
    masks, bn, lin = kparams["masks"], kparams["bn"], kparams["lin"]

    C1P = w1p.shape[0]
    K = int(round((w1p.shape[1] // cin) ** 0.5))
    c2, nout, NP = w2p.shape[0], lin.shape[0] - 1, lin.shape[1]
    L, LP1 = wlt.shape[2], masks.shape[1]
    assert w1p.shape[1] == K * K * cin
    assert w2p.shape[1] == K * K * C1P and wlt.shape[1] == c2
    assert L == B * H * W, (L, B, H, W)

    smax = (K - 1) * W + (K - 1)

    # conv1 patch matrix (K*K*cin, LP1), assembled OFFLINE (outside the
    # kernel): shifted views of the zero-padded (Cin, B*H*W) grid, bf16.
    x2d = jnp.transpose(x, (1, 0, 2, 3)).reshape(cin, L)
    xpad = jnp.pad(x2d, ((0, 0), (0, LP1 + smax - L)))
    p1 = jnp.concatenate(
        [xpad[:, kh * W + kw: kh * W + kw + LP1]
         for kh in range(K) for kw in range(K)],
        axis=0).astype(jnp.bfloat16)

    kernel = _make_kernel(B=B, H=H, W=W, K=K, C1P=C1P, c2=c2, nout=nout,
                          L=L, LP1=LP1, NP=NP)
    out = pl.pallas_call(
        kernel,
        out_shape=jax.ShapeDtypeStruct((B, NP), jnp.float32),
        in_specs=[_vmem()] * 7,
        out_specs=_vmem(),
        scratch_shapes=[pltpu.VMEM((K * K * C1P, L), jnp.bfloat16)],  # conv2 patches
        # Working set is <1 MiB here; the explicit limit leaves headroom on
        # v7x's 64 MiB VMEM.  TODO(synk): at production sizes (240x320) add a
        # leading 'parallel' batch grid axis with a two-pass BN (global stats)
        # so both v7x TensorCores are used instead of one.
        compiler_params=pltpu.CompilerParams(vmem_limit_bytes=32 * 1024 * 1024),
    )(p1, w1p, w2p, wlt, masks, bn, lin)
    return out[:, :nout]


def init_params(key, choices, conv_channels=(9, 16), kernel_size=3,
                input_channels=3, input_height=16, input_width=16):
    """PyTorch-layout parameters (Conv2d OIHW, BN gamma/beta, Linear (out,in))."""
    params = {"conv": [], "linear": []}
    in_c, h, w = input_channels, input_height, input_width
    for out_c in conv_channels:
        key, kw_, kb_, kg_, kt_ = jax.random.split(key, 5)
        params["conv"].append((
            0.1 * jax.random.normal(
                kw_, (out_c, in_c, kernel_size, kernel_size), jnp.float32),
            0.1 * jax.random.normal(kb_, (out_c,), jnp.float32),
            1.0 + 0.1 * jax.random.normal(kg_, (out_c,), jnp.float32),
            0.1 * jax.random.normal(kt_, (out_c,), jnp.float32),
        ))
        in_c = out_c
        h -= kernel_size - 1
        w -= kernel_size - 1
    in_size = in_c * h * w
    key, kw_, kb_ = jax.random.split(key, 3)
    # linear_outputs=[] default => single Linear(in_size -> len(choices))
    params["linear"].append((
        0.05 * jax.random.normal(kw_, (len(choices), in_size), jnp.float32),
        0.05 * jax.random.normal(kb_, (len(choices),), jnp.float32),
    ))
    return params


def prepare_params(params, input_height, input_width, batch_size):
    """One-time repack of torch-layout params into the fused-kernel layout.

    All weight transposes, zero paddings, the torch-flatten permutation of the
    linear weight, the BN validity masks, and the small-parameter packing are
    precomputed here (outside the per-call hot path)."""
    H, W, B = input_height, input_width, batch_size
    (w1, b1, g1, t1), (w2, b2, g2, t2) = params["conv"]
    wl, bl = params["linear"][0]
    K = w1.shape[-1]
    c1, cin = w1.shape[0], w1.shape[1]
    c2 = w2.shape[0]
    nout = wl.shape[0]
    OH1, OW1 = H - (K - 1), W - (K - 1)
    OH2, OW2 = OH1 - (K - 1), OW1 - (K - 1)
    Q = H * W
    L = B * Q
    smax = (K - 1) * W + (K - 1)
    LP1 = _rup(L + smax, LANES)
    NP = _rup(max(nout, 1), LANES)
    C1P = _rup(c1, SUBS)
    f32 = jnp.float32

    # conv weights -> single patch-matmul operands, bf16 (native MXU path).
    w1k = jnp.transpose(w1, (0, 2, 3, 1)).reshape(c1, K * K * cin)
    w1p = jnp.zeros((C1P, K * K * cin), f32).at[:c1].set(w1k).astype(jnp.bfloat16)
    w2k = jnp.transpose(w2, (0, 2, 3, 1)).reshape(c2, K * K, c1)
    w2p = (jnp.zeros((c2, K * K, C1P), f32).at[:, :, :c1].set(w2k)
           .reshape(c2, K * K * C1P).astype(jnp.bfloat16))
    # conv biases b1/b2 intentionally dropped: a per-channel constant is
    # cancelled exactly by training-mode BatchNorm mean subtraction.
    del b1, b2

    # Linear: fold torch's x.view(B,-1) NCHW flatten into a full-grid weight
    # (zeros at invalid grid columns), tiled over batch -> (nout, c2, L), f32.
    wl4 = wl.reshape(nout, c2, OH2, OW2)
    wl_full = jnp.zeros((nout, c2, H, W), f32).at[:, :, :OH2, :OW2].set(wl4)
    wl_t = jnp.tile(wl_full.reshape(nout, c2, Q), (1, 1, B))

    # BN validity masks over the full (b,h,w) grid, precomputed.
    col = jnp.arange(LP1)
    hh = (col // W) % H
    ww = col % W
    m1 = ((col < L) & (hh < OH1) & (ww < OW1)).astype(f32)
    m2 = ((col < L) & (hh < OH2) & (ww < OW2)).astype(f32)
    masks = jnp.stack([m1, m2], axis=0)                       # (2, LP1)

    # Packed small params (fewer tiny DMAs):
    #   bn columns: 0=gamma1, 1=beta1, 2=gamma2, 3=beta2  (per-channel, sublane)
    R = max(C1P, c2)
    bn = jnp.zeros((R, 4), f32)
    bn = bn.at[:c1, 0].set(g1).at[:c1, 1].set(t1)
    bn = bn.at[:c2, 2].set(g2).at[:c2, 3].set(t2)
    #   lin row 0 = linear bias (lane-padded), rows 1..nout = one-hot lane rows
    lin = jnp.zeros((1 + nout, NP), f32)
    lin = lin.at[0, :nout].set(bl)
    lin = lin.at[1:1 + nout, :nout].set(jnp.eye(nout, dtype=f32))

    return {"w1": w1p, "w2": w2p, "wl": wl_t,
            "masks": masks, "bn": bn, "lin": lin}


def reference_forward(params, x, conv_dtype=None):
    """Pure-JAX reference (training-mode BN).

    conv_dtype=jnp.bfloat16 mimics the kernel's bf16 MXU operands (f32
    accumulation) for a tight algorithmic check; conv_dtype=None is the
    all-f32 spec reference."""
    def conv_bn_relu(x, w, b, g, t):
        if conv_dtype is not None:
            xc, wc, prec = x.astype(conv_dtype), w.astype(conv_dtype), None
        else:
            xc, wc, prec = x, w, jax.lax.Precision.HIGHEST
        y = jax.lax.conv_general_dilated(
            xc, wc, window_strides=(1, 1), padding="VALID",
            dimension_numbers=("NCHW", "OIHW", "NCHW"),
            preferred_element_type=jnp.float32, precision=prec)
        y = y + b[None, :, None, None]
        mu = jnp.mean(y, axis=(0, 2, 3), keepdims=True)
        var = jnp.mean((y - mu) ** 2, axis=(0, 2, 3), keepdims=True)
        y = (y - mu) * jax.lax.rsqrt(var + EPS)
        y = y * g[None, :, None, None] + t[None, :, None, None]
        return jnp.maximum(y, 0.0)

    for (w, b, g, t) in params["conv"]:
        x = conv_bn_relu(x, w, b, g, t)
    x = x.reshape(x.shape[0], -1)
    wl, bl = params["linear"][0]
    return jnp.matmul(x, wl.T, precision=jax.lax.Precision.HIGHEST) + bl


if __name__ == "__main__":
    choices = [-1.0, 0.0, 1.0]                 # 3 discrete actions
    B, C, H, W = 2, 3, 16, 16                  # small shapes, same structure
    key = jax.random.PRNGKey(0)
    key, kx = jax.random.split(key)
    x = jax.random.normal(kx, (B, C, H, W), jnp.float32)

    params = init_params(key, choices, conv_channels=(9, 16), kernel_size=3,
                         input_channels=C, input_height=H, input_width=W)
    kparams = prepare_params(params, H, W, B)

    out = jax.jit(forward)(kparams, x)
    out = jax.block_until_ready(out)
    assert out.shape == (B, len(choices)), out.shape

    # Tight check vs a reference using the SAME bf16 matmul-operand rounding
    # (catches real bugs: wrong shift / mask / flatten order).  Expected
    # mismatch is only f32 accumulation-order + bf16 double-rounding noise.
    ref_bf16 = reference_forward(params, x, conv_dtype=jnp.bfloat16)
    err_tight = float(jnp.max(jnp.abs(out - ref_bf16)))
    assert err_tight < 1e-2, f"max abs error vs bf16-operand reference: {err_tight}"

    # Loose check vs the all-f32 reference; bound re-derived for bf16 MXU
    # operands: ~2^-9 operand rounding x BN gain x 2304-wide linear fan-in
    # => a few 1e-2 absolute on O(1) outputs.
    ref_f32 = reference_forward(params, x)
    err_loose = float(jnp.max(jnp.abs(out - ref_f32)))
    assert err_loose < 1e-1, f"max abs error vs f32 reference: {err_loose}"

    print("KERNEL_OK")
</pallas_src>

<mosaic_0001>
module attributes {stable_mosaic.version = 11 : i64} {
  func.func @kernel(%arg0: memref<27x640xbf16, #tpu.memory_space<vmem>>, %arg1: memref<16x27xbf16, #tpu.memory_space<vmem>>, %arg2: memref<16x144xbf16, #tpu.memory_space<vmem>>, %arg3: memref<3x16x512xf32, #tpu.memory_space<vmem>>, %arg4: memref<2x640xf32, #tpu.memory_space<vmem>>, %arg5: memref<16x4xf32, #tpu.memory_space<vmem>>, %arg6: memref<4x128xf32, #tpu.memory_space<vmem>>, %arg7: memref<2x128xf32, #tpu.memory_space<vmem>>, %arg8: memref<144x512xbf16, #tpu.memory_space<vmem>>) attributes {dimension_semantics = [], scalar_prefetch = 0 : i64, scratch_operands = 1 : i64, tpu.core_type = #tpu.core_type<tc>} {
    %c0 = arith.constant 0 : index
    %c0_0 = arith.constant 0 : index
    %0 = vector.load %arg1[%c0, %c0_0] : memref<16x27xbf16, #tpu.memory_space<vmem>>, vector<16x27xbf16>
    %c0_1 = arith.constant 0 : index
    %c0_2 = arith.constant 0 : index
    %1 = vector.load %arg0[%c0_1, %c0_2] : memref<27x640xbf16, #tpu.memory_space<vmem>>, vector<27x640xbf16>
    %cst = arith.constant dense<0.000000e+00> : vector<16x640xf32>
    %2 = tpu.matmul %0, %1, %cst {dimension_numbers = #tpu.dot_dimension_numbers<[1], [0], [0], [1], [0, 0, 1, 1], [], []>} : vector<16x27xbf16>, vector<27x640xbf16>, vector<16x640xf32> -> vector<16x640xf32>
    %c0_3 = arith.constant 0 : index
    %c0_4 = arith.constant 0 : index
    %3 = vector.load %arg4[%c0_3, %c0_4] : memref<2x640xf32, #tpu.memory_space<vmem>>, vector<1x640xf32>
    %4 = vector.broadcast %3 : vector<1x640xf32> to vector<16x640xf32>
    %5 = arith.mulf %2, %4 : vector<16x640xf32>
    %cst_5 = arith.constant dense<0.000000e+00> : vector<16xf32>
    %6 = vector.multi_reduction <add>, %5, %cst_5 [1] : vector<16x640xf32> to vector<16xf32>
    %7 = vector.shape_cast %6 : vector<16xf32> to vector<16x1xf32>
    %cst_6 = arith.constant 0.00255102036 : f32
    %8 = vector.broadcast %cst_6 : f32 to vector<16x1xf32>
    %9 = arith.mulf %7, %8 : vector<16x1xf32>
    %10 = vector.broadcast %9 : vector<16x1xf32> to vector<16x640xf32>
    %11 = arith.subf %2, %10 : vector<16x640xf32>
    %12 = arith.mulf %11, %11 : vector<16x640xf32>
    %13 = vector.broadcast %3 : vector<1x640xf32> to vector<16x640xf32>
    %14 = arith.mulf %12, %13 : vector<16x640xf32>
    %cst_7 = arith.constant dense<0.000000e+00> : vector<16xf32>
    %15 = vector.multi_reduction <add>, %14, %cst_7 [1] : vector<16x640xf32> to vector<16xf32>
    %16 = vector.shape_cast %15 : vector<16xf32> to vector<16x1xf32>
    %cst_8 = arith.constant 0.00255102036 : f32
    %17 = vector.broadcast %cst_8 : f32 to vector<16x1xf32>
    %18 = arith.mulf %16, %17 : vector<16x1xf32>
    %cst_9 = arith.constant 9.99999974E-6 : f32
    %19 = vector.broadcast %cst_9 : f32 to vector<16x1xf32>
    %20 = arith.addf %18, %19 : vector<16x1xf32>
    %21 = math.rsqrt %20 : vector<16x1xf32>
    %c0_10 = arith.constant 0 : index
    %c0_11 = arith.constant 0 : index
    %22 = vector.load %arg5[%c0_10, %c0_11] : memref<16x4xf32, #tpu.memory_space<vmem>>, vector<16x1xf32>
    %23 = arith.mulf %21, %22 : vector<16x1xf32>
    %24 = vector.broadcast %23 : vector<16x1xf32> to vector<16x640xf32>
    %25 = arith.mulf %11, %24 : vector<16x640xf32>
    %c0_12 = arith.constant 0 : index
    %c1 = arith.constant 1 : index
    %26 = vector.load %arg5[%c0_12, %c1] : memref<16x4xf32, #tpu.memory_space<vmem>>, vector<16x1xf32>
    %27 = vector.broadcast %26 : vector<16x1xf32> to vector<16x640xf32>
    %28 = arith.addf %25, %27 : vector<16x640xf32>
    %cst_13 = arith.constant 0.000000e+00 : f32
    %29 = vector.broadcast %cst_13 : f32 to vector<16x640xf32>
    %30 = arith.maximumf %28, %29 : vector<16x640xf32>
    %31 = vector.extract_strided_slice %30 {offsets = [0, 0], sizes = [16, 512], strides = [1, 1]} : vector<16x640xf32> to vector<16x512xf32>
    %32 = arith.truncf %31 : vector<16x512xf32> to vector<16x512xbf16>
    %c0_14 = arith.constant 0 : index
    %c0_15 = arith.constant 0 : index
    %33 = vector.load %arg8[%c0_14, %c0_15] : memref<144x512xbf16, #tpu.memory_space<vmem>>, vector<16x512xbf16>
    tpu.vector_store %arg8[%c0_14, %c0_15], %32 {strides = array<i32>} : memref<144x512xbf16, #tpu.memory_space<vmem>>, vector<16x512xbf16>,
    %c639_i32 = arith.constant 639 : i32
    %34 = tpu.dynamic_rotate %30 by %c639_i32 dim 1 : vector<16x640xf32>, i32 -> vector<16x640xf32>
    %35 = vector.extract_strided_slice %34 {offsets = [0, 0], sizes = [16, 512], strides = [1, 1]} : vector<16x640xf32> to vector<16x512xf32>
    %36 = arith.truncf %35 : vector<16x512xf32> to vector<16x512xbf16>
    %c16 = arith.constant 16 : index
    %c0_16 = arith.constant 0 : index
    %37 = vector.load %arg8[%c16, %c0_16] : memref<144x512xbf16, #tpu.memory_space<vmem>>, vector<16x512xbf16>
    tpu.vector_store %arg8[%c16, %c0_16], %36 {strides = array<i32>} : memref<144x512xbf16, #tpu.memory_space<vmem>>, vector<16x512xbf16>,
    %c638_i32 = arith.constant 638 : i32
    %38 = tpu.dynamic_rotate %30 by %c638_i32 dim 1 : vector<16x640xf32>, i32 -> vector<16x640xf32>
    %39 = vector.extract_strided_slice %38 {offsets = [0, 0], sizes = [16, 512], strides = [1, 1]} : vector<16x640xf32> to vector<16x512xf32>
    %40 = arith.truncf %39 : vector<16x512xf32> to vector<16x512xbf16>
    %c32 = arith.constant 32 : index
    %c0_17 = arith.constant 0 : index
    %41 = vector.load %arg8[%c32, %c0_17] : memref<144x512xbf16, #tpu.memory_space<vmem>>, vector<16x512xbf16>
    tpu.vector_store %arg8[%c32, %c0_17], %40 {strides = array<i32>} : memref<144x512xbf16, #tpu.memory_space<vmem>>, vector<16x512xbf16>,
    %c624_i32 = arith.constant 624 : i32
    %42 = tpu.dynamic_rotate %30 by %c624_i32 dim 1 : vector<16x640xf32>, i32 -> vector<16x640xf32>
    %43 = vector.extract_strided_slice %42 {offsets = [0, 0], sizes = [16, 512], strides = [1, 1]} : vector<16x640xf32> to vector<16x512xf32>
    %44 = arith.truncf %43 : vector<16x512xf32> to vector<16x512xbf16>
    %c48 = arith.constant 48 : index
    %c0_18 = arith.constant 0 : index
    %45 = vector.load %arg8[%c48, %c0_18] : memref<144x512xbf16, #tpu.memory_space<vmem>>, vector<16x512xbf16>
    tpu.vector_store %arg8[%c48, %c0_18], %44 {strides = array<i32>} : memref<144x512xbf16, #tpu.memory_space<vmem>>, vector<16x512xbf16>,
    %c623_i32 = arith.constant 623 : i32
    %46 = tpu.dynamic_rotate %30 by %c623_i32 dim 1 : vector<16x640xf32>, i32 -> vector<16x640xf32>
    %47 = vector.extract_strided_slice %46 {offsets = [0, 0], sizes = [16, 512], strides = [1, 1]} : vector<16x640xf32> to vector<16x512xf32>
    %48 = arith.truncf %47 : vector<16x512xf32> to vector<16x512xbf16>
    %c64 = arith.constant 64 : index
    %c0_19 = arith.constant 0 : index
    %49 = vector.load %arg8[%c64, %c0_19] : memref<144x512xbf16, #tpu.memory_space<vmem>>, vector<16x512xbf16>
    tpu.vector_store %arg8[%c64, %c0_19], %48 {strides = array<i32>} : memref<144x512xbf16, #tpu.memory_space<vmem>>, vector<16x512xbf16>,
    %c622_i32 = arith.constant 622 : i32
    %50 = tpu.dynamic_rotate %30 by %c622_i32 dim 1 : vector<16x640xf32>, i32 -> vector<16x640xf32>
    %51 = vector.extract_strided_slice %50 {offsets = [0, 0], sizes = [16, 512], strides = [1, 1]} : vector<16x640xf32> to vector<16x512xf32>
    %52 = arith.truncf %51 : vector<16x512xf32> to vector<16x512xbf16>
    %c80 = arith.constant 80 : index
    %c0_20 = arith.constant 0 : index
    %53 = vector.load %arg8[%c80, %c0_20] : memref<144x512xbf16, #tpu.memory_space<vmem>>, vector<16x512xbf16>
    tpu.vector_store %arg8[%c80, %c0_20], %52 {strides = array<i32>} : memref<144x512xbf16, #tpu.memory_space<vmem>>, vector<16x512xbf16>,
    %c608_i32 = arith.constant 608 : i32
    %54 = tpu.dynamic_rotate %30 by %c608_i32 dim 1 : vector<16x640xf32>, i32 -> vector<16x640xf32>
    %55 = vector.extract_strided_slice %54 {offsets = [0, 0], sizes = [16, 512], strides = [1, 1]} : vector<16x640xf32> to vector<16x512xf32>
    %56 = arith.truncf %55 : vector<16x512xf32> to vector<16x512xbf16>
    %c96 = arith.constant 96 : index
    %c0_21 = arith.constant 0 : index
    %57 = vector.load %arg8[%c96, %c0_21] : memref<144x512xbf16, #tpu.memory_space<vmem>>, vector<16x512xbf16>
    tpu.vector_store %arg8[%c96, %c0_21], %56 {strides = array<i32>} : memref<144x512xbf16, #tpu.memory_space<vmem>>, vector<16x512xbf16>,
    %c607_i32 = arith.constant 607 : i32
    %58 = tpu.dynamic_rotate %30 by %c607_i32 dim 1 : vector<16x640xf32>, i32 -> vector<16x640xf32>
    %59 = vector.extract_strided_slice %58 {offsets = [0, 0], sizes = [16, 512], strides = [1, 1]} : vector<16x640xf32> to vector<16x512xf32>
    %60 = arith.truncf %59 : vector<16x512xf32> to vector<16x512xbf16>
    %c112 = arith.constant 112 : index
    %c0_22 = arith.constant 0 : index
    %61 = vector.load %arg8[%c112, %c0_22] : memref<144x512xbf16, #tpu.memory_space<vmem>>, vector<16x512xbf16>
    tpu.vector_store %arg8[%c112, %c0_22], %60 {strides = array<i32>} : memref<144x512xbf16, #tpu.memory_space<vmem>>, vector<16x512xbf16>,
    %c606_i32 = arith.constant 606 : i32
    %62 = tpu.dynamic_rotate %30 by %c606_i32 dim 1 : vector<16x640xf32>, i32 -> vector<16x640xf32>
    %63 = vector.extract_strided_slice %62 {offsets = [0, 0], sizes = [16, 512], strides = [1, 1]} : vector<16x640xf32> to vector<16x512xf32>
    %64 = arith.truncf %63 : vector<16x512xf32> to vector<16x512xbf16>
    %c128 = arith.constant 128 : index
    %c0_23 = arith.constant 0 : index
    %65 = vector.load %arg8[%c128, %c0_23] : memref<144x512xbf16, #tpu.memory_space<vmem>>, vector<16x512xbf16>
    tpu.vector_store %arg8[%c128, %c0_23], %64 {strides = array<i32>} : memref<144x512xbf16, #tpu.memory_space<vmem>>, vector<16x512xbf16>,
    %c0_24 = arith.constant 0 : index
    %c0_25 = arith.constant 0 : index
    %66 = vector.load %arg2[%c0_24, %c0_25] : memref<16x144xbf16, #tpu.memory_space<vmem>>, vector<16x144xbf16>
    %c0_26 = arith.constant 0 : index
    %c0_27 = arith.constant 0 : index
    %67 = vector.load %arg8[%c0_26, %c0_27] : memref<144x512xbf16, #tpu.memory_space<vmem>>, vector<144x512xbf16>
    %cst_28 = arith.constant dense<0.000000e+00> : vector<16x512xf32>
    %68 = tpu.matmul %66, %67, %cst_28 {dimension_numbers = #tpu.dot_dimension_numbers<[1], [0], [0], [1], [0, 0, 1, 1], [], []>} : vector<16x144xbf16>, vector<144x512xbf16>, vector<16x512xf32> -> vector<16x512xf32>
    %c1_29 = arith.constant 1 : index
    %c0_30 = arith.constant 0 : index
    %69 = vector.load %arg4[%c1_29, %c0_30] : memref<2x640xf32, #tpu.memory_space<vmem>>, vector<1x512xf32>
    %70 = vector.broadcast %69 : vector<1x512xf32> to vector<16x512xf32>
    %71 = arith.mulf %68, %70 : vector<16x512xf32>
    %cst_31 = arith.constant dense<0.000000e+00> : vector<16xf32>
    %72 = vector.multi_reduction <add>, %71, %cst_31 [1] : vector<16x512xf32> to vector<16xf32>
    %73 = vector.shape_cast %72 : vector<16xf32> to vector<16x1xf32>
    %cst_32 = arith.constant 0.00347222225 : f32
    %74 = vector.broadcast %cst_32 : f32 to vector<16x1xf32>
    %75 = arith.mulf %73, %74 : vector<16x1xf32>
    %76 = vector.broadcast %75 : vector<16x1xf32> to vector<16x512xf32>
    %77 = arith.subf %68, %76 : vector<16x512xf32>
    %78 = arith.mulf %77, %77 : vector<16x512xf32>
    %79 = vector.broadcast %69 : vector<1x512xf32> to vector<16x512xf32>
    %80 = arith.mulf %78, %79 : vector<16x512xf32>
    %cst_33 = arith.constant dense<0.000000e+00> : vector<16xf32>
    %81 = vector.multi_reduction <add>, %80, %cst_33 [1] : vector<16x512xf32> to vector<16xf32>
    %82 = vector.shape_cast %81 : vector<16xf32> to vector<16x1xf32>
    %cst_34 = arith.constant 0.00347222225 : f32
    %83 = vector.broadcast %cst_34 : f32 to vector<16x1xf32>
    %84 = arith.mulf %82, %83 : vector<16x1xf32>
    %cst_35 = arith.constant 9.99999974E-6 : f32
    %85 = vector.broadcast %cst_35 : f32 to vector<16x1xf32>
    %86 = arith.addf %84, %85 : vector<16x1xf32>
    %87 = math.rsqrt %86 : vector<16x1xf32>
    %c0_36 = arith.constant 0 : index
    %c2 = arith.constant 2 : index
    %88 = vector.load %arg5[%c0_36, %c2] : memref<16x4xf32, #tpu.memory_space<vmem>>, vector<16x1xf32>
    %89 = arith.mulf %87, %88 : vector<16x1xf32>
    %90 = vector.broadcast %89 : vector<16x1xf32> to vector<16x512xf32>
    %91 = arith.mulf %77, %90 : vector<16x512xf32>
    %c0_37 = arith.constant 0 : index
    %c3 = arith.constant 3 : index
    %92 = vector.load %arg5[%c0_37, %c3] : memref<16x4xf32, #tpu.memory_space<vmem>>, vector<16x1xf32>
    %93 = vector.broadcast %92 : vector<16x1xf32> to vector<16x512xf32>
    %94 = arith.addf %91, %93 : vector<16x512xf32>
    %cst_38 = arith.constant 0.000000e+00 : f32
    %95 = vector.broadcast %cst_38 : f32 to vector<16x512xf32>
    %96 = arith.maximumf %94, %95 : vector<16x512xf32>
    %c0_39 = arith.constant 0 : index
    %c0_40 = arith.constant 0 : index
    %97 = vector.load %arg6[%c0_39, %c0_40] : memref<4x128xf32, #tpu.memory_space<vmem>>, vector<1x128xf32>
    %c0_41 = arith.constant 0 : index
    %c0_42 = arith.constant 0 : index
    %c0_43 = arith.constant 0 : index
    %98 = vector.load %arg3[%c0_41, %c0_42, %c0_43] : memref<3x16x512xf32, #tpu.memory_space<vmem>>, vector<1x16x512xf32>
    %99 = vector.shape_cast %98 : vector<1x16x512xf32> to vector<16x512xf32>
    %100 = arith.mulf %96, %99 : vector<16x512xf32>
    %cst_44 = arith.constant dense<0.000000e+00> : vector<512xf32>
    %101 = vector.multi_reduction <add>, %100, %cst_44 [0] : vector<16x512xf32> to vector<512xf32>
    %102 = vector.shape_cast %101 : vector<512xf32> to vector<1x512xf32>
    %c1_45 = arith.constant 1 : index
    %c0_46 = arith.constant 0 : index
    %103 = vector.load %arg6[%c1_45, %c0_46] : memref<4x128xf32, #tpu.memory_space<vmem>>, vector<1x128xf32>
    %104 = vector.extract_strided_slice %102 {offsets = [0, 0], sizes = [1, 256], strides = [1, 1]} : vector<1x512xf32> to vector<1x256xf32>
    %cst_47 = arith.constant dense<0.000000e+00> : vector<1xf32>
    %105 = vector.multi_reduction <add>, %104, %cst_47 [1] : vector<1x256xf32> to vector<1xf32>
    %106 = vector.shape_cast %105 : vector<1xf32> to vector<1x1xf32>
    %107 = vector.broadcast %106 : vector<1x1xf32> to vector<1x128xf32>
    %108 = arith.mulf %107, %103 : vector<1x128xf32>
    %109 = arith.addf %97, %108 : vector<1x128xf32>
    %110 = vector.extract_strided_slice %102 {offsets = [0, 256], sizes = [1, 256], strides = [1, 1]} : vector<1x512xf32> to vector<1x256xf32>
    %cst_48 = arith.constant dense<0.000000e+00> : vector<1xf32>
    %111 = vector.multi_reduction <add>, %110, %cst_48 [1] : vector<1x256xf32> to vector<1xf32>
    %112 = vector.shape_cast %111 : vector<1xf32> to vector<1x1xf32>
    %113 = vector.broadcast %112 : vector<1x1xf32> to vector<1x128xf32>
    %114 = arith.mulf %113, %103 : vector<1x128xf32>
    %115 = arith.addf %97, %114 : vector<1x128xf32>
    %c1_49 = arith.constant 1 : index
    %c0_50 = arith.constant 0 : index
    %c0_51 = arith.constant 0 : index
    %116 = vector.load %arg3[%c1_49, %c0_50, %c0_51] : memref<3x16x512xf32, #tpu.memory_space<vmem>>, vector<1x16x512xf32>
    %117 = vector.shape_cast %116 : vector<1x16x512xf32> to vector<16x512xf32>
    %118 = arith.mulf %96, %117 : vector<16x512xf32>
    %cst_52 = arith.constant dense<0.000000e+00> : vector<512xf32>
    %119 = vector.multi_reduction <add>, %118, %cst_52 [0] : vector<16x512xf32> to vector<512xf32>
    %120 = vector.shape_cast %119 : vector<512xf32> to vector<1x512xf32>
    %c2_53 = arith.constant 2 : index
    %c0_54 = arith.constant 0 : index
    %121 = vector.load %arg6[%c2_53, %c0_54] : memref<4x128xf32, #tpu.memory_space<vmem>>, vector<1x128xf32>
    %122 = vector.extract_strided_slice %120 {offsets = [0, 0], sizes = [1, 256], strides = [1, 1]} : vector<1x512xf32> to vector<1x256xf32>
    %cst_55 = arith.constant dense<0.000000e+00> : vector<1xf32>
    %123 = vector.multi_reduction <add>, %122, %cst_55 [1] : vector<1x256xf32> to vector<1xf32>
    %124 = vector.shape_cast %123 : vector<1xf32> to vector<1x1xf32>
    %125 = vector.broadcast %124 : vector<1x1xf32> to vector<1x128xf32>
    %126 = arith.mulf %125, %121 : vector<1x128xf32>
    %127 = arith.addf %109, %126 : vector<1x128xf32>
    %128 = vector.extract_strided_slice %120 {offsets = [0, 256], sizes = [1, 256], strides = [1, 1]} : vector<1x512xf32> to vector<1x256xf32>
    %cst_56 = arith.constant dense<0.000000e+00> : vector<1xf32>
    %129 = vector.multi_reduction <add>, %128, %cst_56 [1] : vector<1x256xf32> to vector<1xf32>
    %130 = vector.shape_cast %129 : vector<1xf32> to vector<1x1xf32>
    %131 = vector.broadcast %130 : vector<1x1xf32> to vector<1x128xf32>
    %132 = arith.mulf %131, %121 : vector<1x128xf32>
    %133 = arith.addf %115, %132 : vector<1x128xf32>
    %c2_57 = arith.constant 2 : index
    %c0_58 = arith.constant 0 : index
    %c0_59 = arith.constant 0 : index
    %134 = vector.load %arg3[%c2_57, %c0_58, %c0_59] : memref<3x16x512xf32, #tpu.memory_space<vmem>>, vector<1x16x512xf32>
    %135 = vector.shape_cast %134 : vector<1x16x512xf32> to vector<16x512xf32>
    %136 = arith.mulf %96, %135 : vector<16x512xf32>
    %cst_60 = arith.constant dense<0.000000e+00> : vector<512xf32>
    %137 = vector.multi_reduction <add>, %136, %cst_60 [0] : vector<16x512xf32> to vector<512xf32>
    %138 = vector.shape_cast %137 : vector<512xf32> to vector<1x512xf32>
    %c3_61 = arith.constant 3 : index
    %c0_62 = arith.constant 0 : index
    %139 = vector.load %arg6[%c3_61, %c0_62] : memref<4x128xf32, #tpu.memory_space<vmem>>, vector<1x128xf32>
    %140 = vector.extract_strided_slice %138 {offsets = [0, 0], sizes = [1, 256], strides = [1, 1]} : vector<1x512xf32> to vector<1x256xf32>
    %cst_63 = arith.constant dense<0.000000e+00> : vector<1xf32>
    %141 = vector.multi_reduction <add>, %140, %cst_63 [1] : vector<1x256xf32> to vector<1xf32>
    %142 = vector.shape_cast %141 : vector<1xf32> to vector<1x1xf32>
    %143 = vector.broadcast %142 : vector<1x1xf32> to vector<1x128xf32>
    %144 = arith.mulf %143, %139 : vector<1x128xf32>
    %145 = arith.addf %127, %144 : vector<1x128xf32>
    %146 = vector.extract_strided_slice %138 {offsets = [0, 256], sizes = [1, 256], strides = [1, 1]} : vector<1x512xf32> to vector<1x256xf32>
    %cst_64 = arith.constant dense<0.000000e+00> : vector<1xf32>
    %147 = vector.multi_reduction <add>, %146, %cst_64 [1] : vector<1x256xf32> to vector<1xf32>
    %148 = vector.shape_cast %147 : vector<1xf32> to vector<1x1xf32>
    %149 = vector.broadcast %148 : vector<1x1xf32> to vector<1x128xf32>
    %150 = arith.mulf %149, %139 : vector<1x128xf32>
    %151 = arith.addf %133, %150 : vector<1x128xf32>
    %c0_65 = arith.constant 0 : index
    %c0_66 = arith.constant 0 : index
    %152 = vector.load %arg7[%c0_65, %c0_66] : memref<2x128xf32, #tpu.memory_space<vmem>>, vector<1x128xf32>
    tpu.vector_store %arg7[%c0_65, %c0_66], %145 {strides = array<i32>} : memref<2x128xf32, #tpu.memory_space<vmem>>, vector<1x128xf32>,
    %c1_67 = arith.constant 1 : index
    %c0_68 = arith.constant 0 : index
    %153 = vector.load %arg7[%c1_67, %c0_68] : memref<2x128xf32, #tpu.memory_space<vmem>>, vector<1x128xf32>
    tpu.vector_store %arg7[%c1_67, %c0_68], %151 {strides = array<i32>} : memref<2x128xf32, #tpu.memory_space<vmem>>, vector<1x128xf32>,
    return
  }
}

</mosaic_0001>

<bundles_post_ra>
// kernel: forward.1
= control target key start
LH: loop header
LB: loop body
LE: loop exit
PB: predicated region body
PF: predicated region fallthrough
CT: control target
= control target key end

     0   :  { %vm98_vm0 = vcmask 1044480   ;;  %vm99_vm1 = vcmask 1045504   ;;  %v1476_v4 = vmov 65535   ;;  %v1477_v6 = vmov 0   ;;  %s1993_s0 = inlined_call_operand.vmem [shape: bf16[27,640], index: 0, kind: input, shape index: {}]   ;;  %s1994_s1 = inlined_call_operand.vmem [shape: bf16[16,27], index: 1, kind: input, shape index: {}]   ;;  %s1995_s2 = inlined_call_operand.vmem [shape: bf16[16,144], index: 2, kind: input, shape index: {}]   ;;  %s1996_s3 = inlined_call_operand.vmem [shape: f32[3,16,512], index: 3, kind: input, shape index: {}]   ;;  %s1997_s4 = inlined_call_operand.vmem [shape: f32[2,640], index: 4, kind: input, shape index: {}]   ;;  %s1998_s5 = inlined_call_operand.vmem [shape: f32[16,4], index: 5, kind: input, shape index: {}]   ;;  %s1999_s6 = inlined_call_operand.vmem [shape: f32[4,128], index: 6, kind: input, shape index: {}]   ;;  %s2000_s7 = inlined_call_operand.hbm [shape: f32[2,128], index: 7, kind: output, shape index: {}]  }
   0x1   :  { %v1426_v0 = vld [vmem:[%s1993_s0 + $0x4] ss:$20 sps:$4 sm:$0xff]   ;;  %v1428_v1 = vld [vmem:[%s1993_s0] ss:$20 sps:$4 sm:$0xff]   ;;  %v1431_v3 = vld [vmem:[%s1993_s0 + $0x8] ss:$20 sps:$4 sm:$0xff]   ;;  %149 = vmatprep.mubr.bf16.mxu0 %v1477_v6  ;;  %192 = vmatprep.mubr.bf16.mxu1 %v1477_v6 }
   0x2   :  { %117 = vmatprep.subr.bf16.mxu0 %v1426_v0  ;;  %v1429_v2 = vld [vmem:[%s1993_s0 + $0xc] ss:$20 sps:$4 sm:$0xff]   ;;  %v100_v5 = vsel %vm98_vm0, 4294967295, %v1476_v4  ;;  %v1434_v9 = vld [vmem:[%s1993_s0 + $0x28] ss:$20 sps:$4 sm:$0x3f]   ;;  %1217 = vset.pattern.permute.xlu0 %v1477_v6 }
   0x3   :  { %118 = vmatpush1.bf16.msra.mxu0 %v1428_v1  ;;  %v1432_v7 = vld [vmem:[%s1993_s0 + $0x2c] ss:$20 sps:$4 sm:$0x3f]   ;;  %v101_v8 = vsel %vm99_vm1, %v100_v5, 0  ;;  %160 = vmatprep.subr.bf16.mxu1 %v1429_v2  ;;  %vm94_vm2 = vcmask 220160   ;;  %v1478_v18 = vmov 0.0  }
   0x4   :  { %161 = vmatpush1.bf16.msra.mxu1 %v1431_v3  ;;  %v106_v10 = vand.u32 %v1432_v7, %v101_v8  ;;  %v1435_v11 = vld [vmem:[%s1993_s0 + $0x34] ss:$20 sps:$4 sm:$0x3f]   ;;  %v1437_v12 = vld [vmem:[%s1993_s0 + $0x30] ss:$20 sps:$4 sm:$0x3f]   ;;  %v103_v13 = vand.u32 %v1434_v9, %v101_v8 }
   0x5   :  { %v1438_v14 = vld [vmem:[%s1994_s1] sm:$0xff]   ;;  %v112_v15 = vand.u32 %v1435_v11, %v101_v8  ;;  %v109_v16 = vand.u32 %v1437_v12, %v101_v8  ;;  %v1440_v19 = vld [vmem:[%s1993_s0 + $0x38] ss:$20 sps:$4 sm:$0x3f]  }
   0x6   :  { %119 = vmatprep.subr.bf16.mxu0 %v106_v10  ;;  %v1439_v17 = vld [vmem:[%s1993_s0 + $0x10] ss:$20 sps:$4 sm:$0xff]  }
   0x7   :  { %120 = vmatpush1.bf16.msra.mxu0 %v103_v13  ;;  %162 = vmatprep.subr.bf16.mxu1 %v112_v15 }
   0x8   :  { %1193 = vmatprep.subr.bf16.mxu0 %v1478_v18  ;;  %163 = vmatpush1.bf16.msra.mxu1 %v109_v16 }
   0x9   :  { %12 = vsyncpa [#allocation4], 0  ;;  %v115_v20 = vand.u32 %v1440_v19, %v101_v8  ;;  %vm1479_vm3 = vmmov 0   ;;  %v246_v21 = vlaneseq  ;;  %v244_v24 = vld [vmem:[%s1997_s4] ss:$2 sm:$0x1f] }
   0xa   :  { %1166 = vmatmul.mubr.msk.bf16.vlgmr.msra.gmra.mrb[0].mxu0 %vm94_vm2, %v1438_v14  ;;  %s1482_s27 = smov 127   ;;  %s1483_s28 = smov 112   ;;  %vm750_vm4 = vcmask 130048  }
   0xb   :  { %1194 = vmatpush3.bf16.msra.mxu0 %v1439_v17  ;;  %1197 = vmatprep.mubr.msk.bf16.mxu0 %vm1479_vm3, %v1478_v18  ;;  %v1572_v22 = vshrl.u32 %v246_v21, 7  ;;  %s1484_s29 = smov 111   ;;  %s1485_s30 = smov 110  }
   0xc   :  { %1167 = vmatmul.mubr.msk.bf16.vlgmr.msra.gmra.mrb[0].mxu1 %vm94_vm2, %v1438_v14  ;;  %1195 = vmatprep.subr.bf16.mxu0 %v1478_v18  ;;  %s1486_s8 = smov 96   ;;  %s1487_s9 = smov 95  }
   0xd   :  { %v248_v23 = vsub.s32 0, %v1572_v22  ;;  %v252_v25 = vsub.s32 1, %v1572_v22  ;;  %v256_v26 = vsub.s32 2, %v1572_v22  ;;  %v260_v27 = vsub.s32 3, %v1572_v22  ;;  %s1488_s10 = smov 94   ;;  %s1491_s15 = smov [#allocation3]  }
   0xe   :  { %v264_v35 = vsub.s32 4, %v1572_v22 }
   0xf   :  { %1196 = vmatpush3.bf16.msra.mxu0 %v115_v20  ;;  %v1583_v28 = vrot.slane %v244_v24, %v248_v23  ;;  %v1587_v29 = vrot.slane %v244_v24, %v252_v25  ;;  %v1591_v30 = vrot.slane %v244_v24, %v256_v26  ;;  %v1595_v32 = vrot.slane %v244_v24, %v260_v27 }
  0x10   :  { %v265_v49 = vrot.slane %v244_v24, %v264_v35 }
  0x12   :  { %1198 = vmatmul.mubr.msk.bf16.vlgmr.msra.gmra.mrb[4].mxu0 %vm94_vm2, %v1438_v14 }
  0xdd   :  { %v151_v31 = vpop.f32.mrb[0].mxu0 }
  0xde   :  { %v271_v33 = vmul.f32 %v1583_v28, %v151_v31  ;;  %v153_v34 = vpop.f32.mrb[1].mxu0 }
  0xdf   :  { %v272_v36 = vmul.f32 %v1587_v29, %v153_v34  ;;  %v155_v37 = vpop.f32.mrb[2].mxu0  ;;  %v194_v38 = vpop.f32.mrb[0].mxu1 }
  0xe0   :  { %v276_v39 = vmul.f32 %v1583_v28, %v155_v37  ;;  %v273_v40 = vmul.f32 %v1591_v30, %v194_v38  ;;  %v157_v41 = vpop.f32.mrb[3].mxu0  ;;  %v196_v42 = vpop.f32.mrb[1].mxu1 }
  0xe1   :  { %v281_v43 = vadd.f32 %v272_v36, %v271_v33  ;;  %v277_v44 = vmul.f32 %v1587_v29, %v157_v41  ;;  %v274_v45 = vmul.f32 %v1595_v32, %v196_v42  ;;  %v198_v46 = vpop.f32.mrb[2].mxu1 }
  0xe2   :  { %v278_v47 = vmul.f32 %v1591_v30, %v198_v46  ;;  %v200_v48 = vpop.f32.mrb[3].mxu1 }
  0xe3   :  { %v282_v50 = vadd.f32 %v281_v43, %v273_v40  ;;  %v287_v51 = vadd.f32 %v277_v44, %v276_v39  ;;  %v279_v53 = vmul.f32 %v1595_v32, %v200_v48 }
  0xe5   :  { %v288_v52 = vadd.f32 %v287_v51, %v278_v47  ;;  %v237_v54 = vpop.f32.mrb[4].mxu0  ;;  %v283_v55 = vadd.f32 %v282_v50, %v274_v45 }
  0xe6   :  { %v275_v56 = vmul.f32 %v265_v49, %v237_v54  ;;  %v1199_v57 = vpop.f32.mrb[5].mxu0 }
  0xe7   :  { %v240_v58 = vpop.f32.mrb[6].mxu0  ;;  %v289_v59 = vadd.f32 %v288_v52, %v279_v53 }
  0xe8   :  { %v280_v60 = vmul.f32 %v265_v49, %v240_v58  ;;  %v1200_v61 = vpop.f32.mrb[7].mxu0  ;;  %v284_v62 = vadd.f32 %v283_v55, %v275_v56 }
  0xea   :  { %285 = vadd.xlane.f32.xlu0 %v284_v62  ;;  %v290_v63 = vadd.f32 %v289_v59, %v280_v60  ;;  %v1657_v59 = vld [vmem:[%s1998_s5 + $0x8] sm:$0xff] }
  0xee   :  { %291 = vadd.xlane.f32.xlu0 %v290_v63 }
 0x177   :  { %v286_v0 = vpop.xlane.xlu0 %285 }
 0x178   :  { %v293_v1 = vmul.f32 0.0025510204, %v286_v0 }
 0x17a   :  { %v1606_v2 = vsub.f32 %v151_v31, %v293_v1  ;;  %v1608_v3 = vsub.f32 %v153_v34, %v293_v1  ;;  %v1610_v4 = vsub.f32 %v194_v38, %v293_v1  ;;  %v1612_v5 = vsub.f32 %v196_v42, %v293_v1 }
 0x17b   :  { %v292_v7 = vpop.xlane.xlu0 %291  ;;  %v1614_v8 = vsub.f32 %v237_v54, %v293_v1 }
 0x17c   :  { %v294_v9 = vmul.f32 0.0025510204, %v292_v7  ;;  %v305_v10 = vmul.f32 %v1606_v2, %v1606_v2  ;;  %v306_v11 = vmul.f32 %v1608_v3, %v1608_v3  ;;  %v307_v12 = vmul.f32 %v1610_v4, %v1610_v4 }
 0x17d   :  { %v308_v13 = vmul.f32 %v1612_v5, %v1612_v5  ;;  %v309_v18 = vmul.f32 %v1614_v8, %v1614_v8 }
 0x17e   :  { %v1624_v14 = vsub.f32 %v155_v37, %v294_v9  ;;  %v1626_v15 = vsub.f32 %v157_v41, %v294_v9  ;;  %v315_v16 = vmul.f32 %v305_v10, %v1583_v28  ;;  %v316_v17 = vmul.f32 %v306_v11, %v1587_v29 }
 0x17f   :  { %v302_v19 = vsub.f32 %v198_v46, %v294_v9  ;;  %v317_v20 = vmul.f32 %v307_v12, %v1591_v30  ;;  %v303_v31 = vsub.f32 %v200_v48, %v294_v9  ;;  %v1635_v34 = vsub.f32 %v240_v58, %v294_v9 }
 0x180   :  { %v325_v24 = vadd.f32 %v316_v17, %v315_v16  ;;  %v310_v33 = vmul.f32 %v1624_v14, %v1624_v14  ;;  %v311_v35 = vmul.f32 %v1626_v15, %v1626_v15  ;;  %v318_v37 = vmul.f32 %v308_v13, %v1595_v32 }
 0x181   :  { %v312_v36 = vmul.f32 %v302_v19, %v302_v19  ;;  %v313_v40 = vmul.f32 %v303_v31, %v303_v31  ;;  %v319_v42 = vmul.f32 %v309_v18, %v265_v49  ;;  %v314_v44 = vmul.f32 %v1635_v34, %v1635_v34 }
 0x182   :  { %v326_v38 = vadd.f32 %v325_v24, %v317_v20  ;;  %v320_v39 = vmul.f32 %v310_v33, %v1583_v28  ;;  %v321_v41 = vmul.f32 %v311_v35, %v1587_v29  ;;  %v1649_v28 = vld [vmem:[%s1998_s5] sm:$0xff]  ;;  %v1480_v29 = vmov 1   ;;  %s1481_s5 = smov 126  }
 0x183   :  { %v322_v45 = vmul.f32 %v312_v36, %v1591_v30  ;;  %v323_v48 = vmul.f32 %v313_v40, %v1595_v32  ;;  %v324_v51 = vmul.f32 %v314_v44, %v265_v49  ;;  %1218 = vset.pattern.permute.xlu1 %v1480_v29 }
 0x184   :  { %v327_v43 = vadd.f32 %v326_v38, %v318_v37  ;;  %v331_v46 = vadd.f32 %v321_v41, %v320_v39 }
 0x186   :  { %v328_v47 = vadd.f32 %v327_v43, %v319_v42  ;;  %v332_v50 = vadd.f32 %v331_v46, %v322_v45 }
 0x188   :  { %329 = vadd.xlane.f32.xlu1 %v328_v47  ;;  %v333_v52 = vadd.f32 %v332_v50, %v323_v48 }
 0x18a   :  { %v334_v53 = vadd.f32 %v333_v52, %v324_v51  ;;  %v1441_v52 = vld [vmem:[%s1995_s2 + $0x4] ss:$8 sps:$4 sm:$0xff]  }
 0x18b   :  { %1171 = vmatprep.mubr.msk.bf16.mxu1 %vm750_vm4, %v1441_v52  ;;  %1172 = vmatprep.mubr.msk.bf16.mxu0 %vm750_vm4, %v1441_v52 }
 0x18c   :  { %335 = vadd.xlane.f32.xlu1 %v334_v53 }
 0x19d   :  { %369 = vperm.xlu1 %1218, %v1649_v28  }
 0x1a1   :  { %1219 = vset.pattern.permute.xlu1 %v1477_v6 }
 0x215   :  { %v330_v30 = vpop.xlane.xlu1 %329 }
 0x216   :  { %v337_v54 = vmul.f32 0.0025510204, %v330_v30 }
 0x218   :  { %v339_v32 = vadd.f32 1e-05, %v337_v54 }
 0x219   :  { %v336_v55 = vpop.xlane.xlu1 %335 }
 0x21a   :  { %1444 = vrsqrt.f32 %v339_v32  ;;  %v338_v49 = vmul.f32 0.0025510204, %v336_v55 }
 0x21c   :  { %v340_v56 = vadd.f32 1e-05, %v338_v49 }
 0x21d   :  { %v370_v61 = vpop.permute.xlu1 %369 }
 0x21e   :  { %1446 = vrsqrt.f32 %v340_v56 }
 0x224   :  { %v1445_v57 = vpop.eup %1444 }
 0x225   :  { %v345_v58 = vmul.f32 %v1445_v57, %v1649_v28 }
 0x227   :  { %349 = vperm.xlu0 %1217, %v345_v58  }
 0x228   :  { %v1447_v60 = vpop.eup %1446 }
 0x229   :  { %v346_v6 = vmul.f32 %v1447_v60, %v1657_v59 }
 0x22b   :  { %354 = vperm.xlu1 %1219, %v346_v6  }
 0x22f   :  { %1220 = vset.pattern.permute.xlu1 %v1480_v29  ;;  %v1673_v29 = vand.u32 127, %v246_v21 }
 0x230   :  { %374 = vperm.xlu1 %1220, %v1657_v59  }
 0x231   :  { %vm427_vm5 = vcmp.lt.s32.totalorder %v1673_v29, 127  ;;  %vm464_vm6 = vcmp.lt.s32.totalorder %v1673_v29, 126  ;;  %vm501_vm7 = vcmp.lt.s32.totalorder %v1673_v29, 112  ;;  %vm538_vm8 = vcmp.lt.s32.totalorder %v1673_v29, 111 }
 0x232   :  { %vm575_vm9 = vcmp.lt.s32.totalorder %v1673_v29, 110  ;;  %vm612_vm10 = vcmp.lt.s32.totalorder %v1673_v29, 96  ;;  %vm649_vm11 = vcmp.lt.s32.totalorder %v1673_v29, 95  ;;  %vm686_vm12 = vcmp.lt.s32.totalorder %v1673_v29, 94 }
 0x2a6   :  { %v350_v62 = vpop.permute.xlu0 %349 }
 0x2a7   :  { %v357_v63 = vmul.f32 %v350_v62, %v1606_v2  ;;  %v358_v0 = vmul.f32 %v350_v62, %v1608_v3  ;;  %v360_v1 = vmul.f32 %v350_v62, %v1612_v5  ;;  %v359_v9 = vmul.f32 %v350_v62, %v1610_v4 }
 0x2a8   :  { %v361_v20 = vmul.f32 %v350_v62, %v1614_v8 }
 0x2a9   :  { %v377_v10 = vadd.f32 %v370_v61, %v357_v63  ;;  %v378_v11 = vadd.f32 %v370_v61, %v358_v0  ;;  %v380_v12 = vadd.f32 %v370_v61, %v360_v1  ;;  %v379_v24 = vadd.f32 %v370_v61, %v359_v9 }
 0x2aa   :  { %v355_v7 = vpop.permute.xlu1 %354  ;;  %v381_v45 = vadd.f32 %v370_v61, %v361_v20 }
 0x2ab   :  { %v362_v13 = vmul.f32 %v355_v7, %v1624_v14  ;;  %v363_v16 = vmul.f32 %v355_v7, %v1626_v15  ;;  %v364_v17 = vmul.f32 %v355_v7, %v302_v19  ;;  %v365_v18 = vmul.f32 %v355_v7, %v303_v31 }
 0x2ac   :  { %v387_v36 = vmax.f32 %v377_v10, 0.0  ;;  %v388_v37 = vmax.f32 %v378_v11, 0.0  ;;  %v390_v4 = vmax.f32 %v380_v12, 0.0  ;;  %v366_v38 = vmul.f32 %v355_v7, %v1635_v34 }
 0x2ad   :  { %v389_v15 = vmax.f32 %v379_v24, 0.0  ;;  %v391_v48 = vmax.f32 %v381_v45, 0.0 }
 0x2af   :  { %v375_v2 = vpop.permute.xlu1 %374 }
 0x2b0   :  { %v382_v33 = vadd.f32 %v375_v2, %v362_v13  ;;  %v383_v3 = vadd.f32 %v375_v2, %v363_v16  ;;  %v384_v35 = vadd.f32 %v375_v2, %v364_v17  ;;  %v385_v5 = vadd.f32 %v375_v2, %v365_v18 }
 0x2b1   :  { %v386_v19 = vadd.f32 %v375_v2, %v366_v38 }
 0x2b2   :  { %v392_v39 = vmax.f32 %v382_v33, 0.0  ;;  %v393_v40 = vmax.f32 %v383_v3, 0.0  ;;  %v394_v14 = vmax.f32 %v384_v35, 0.0  ;;  %v395_v41 = vmax.f32 %v385_v5, 0.0 }
 0x2b3   :  { %v396_v46 = vmax.f32 %v386_v19, 0.0 }
 0x2b4   :  { %v400_v31 = vpack.c.bf16 %v395_v41, %v390_v4  ;;  %v1246_v42 = vpack.i.bf16 %v393_v40, %v388_v37  ;;  %v398_v8 = vpack.c.bf16 %v393_v40, %v388_v37  ;;  %v397_v43 = vpack.c.bf16 %v392_v39, %v387_v36 }
 0x2b5   :  { %v399_v44 = vpack.c.bf16 %v394_v14, %v389_v15  ;;  %v1256_v34 = vpack.i.bf16 %v392_v39, %v387_v36  ;;  %v1226_v47 = vpack.i.bf16 %v394_v14, %v389_v15  ;;  %v1266_v50 = vpack.i.bf16 %v396_v46, %v391_v48 }
 0x2b6   :  { %797 = vmatprep.subr.bf16.mxu0 %v400_v31  ;;  %1247 = vrot.lane.b32.xlu0 %v1246_v42, %s1481_s5  ;;  %v1236_v51 = vpack.i.bf16 %v395_v41, %v390_v4 }
 0x2b7   :  { %1222 = vrot.lane.b32.xlu1 %v1246_v42, %s1482_s27  ;;  %754 = vmatprep.subr.bf16.mxu1 %v398_v8 }
 0x2b8   :  { %755 = vmatpush1.bf16.msra.mxu1 %v397_v43  ;;  %798 = vmatpush1.bf16.msra.mxu0 %v399_v44 }
 0x2ba   :  { %1257 = vrot.lane.b32.xlu0 %v1256_v34, %s1481_s5 }
 0x2bb   :  { %1227 = vrot.lane.b32.xlu1 %v1226_v47, %s1482_s27 }
 0x2be   :  { %1267 = vrot.lane.b32.xlu0 %v1266_v50, %s1481_s5 }
 0x2bf   :  { %1232 = vrot.lane.b32.xlu1 %v1256_v34, %s1482_s27 }
 0x2c2   :  { %1277 = vrot.lane.b32.xlu0 %v1226_v47, %s1483_s28 }
 0x2c3   :  { %1237 = vrot.lane.b32.xlu1 %v1236_v51, %s1482_s27 }
 0x2c6   :  { %1287 = vrot.lane.b32.xlu0 %v1236_v51, %s1483_s28 }
 0x2c7   :  { %1242 = vrot.lane.b32.xlu1 %v1266_v50, %s1482_s27 }
 0x2ca   :  { %1297 = vrot.lane.b32.xlu0 %v1246_v42, %s1484_s29 }
 0x2cb   :  { %1252 = vrot.lane.b32.xlu1 %v1226_v47, %s1481_s5 }
 0x2ce   :  { %1307 = vrot.lane.b32.xlu0 %v1256_v34, %s1484_s29 }
 0x2cf   :  { %1262 = vrot.lane.b32.xlu1 %v1236_v51, %s1481_s5 }
 0x2d2   :  { %1317 = vrot.lane.b32.xlu0 %v1266_v50, %s1484_s29 }
 0x2d3   :  { %1272 = vrot.lane.b32.xlu1 %v1246_v42, %s1483_s28 }
 0x2d6   :  { %1327 = vrot.lane.b32.xlu0 %v1226_v47, %s1485_s30 }
 0x2d7   :  { %1282 = vrot.lane.b32.xlu1 %v1256_v34, %s1483_s28 }
 0x2da   :  { %1337 = vrot.lane.b32.xlu0 %v1236_v51, %s1485_s30 }
 0x2db   :  { %1292 = vrot.lane.b32.xlu1 %v1266_v50, %s1483_s28 }
 0x2de   :  { %1347 = vrot.lane.b32.xlu0 %v1246_v42, %s1486_s8 }
 0x2df   :  { %1302 = vrot.lane.b32.xlu1 %v1226_v47, %s1484_s29 }
 0x2e2   :  { %1357 = vrot.lane.b32.xlu0 %v1256_v34, %s1486_s8 }
 0x2e3   :  { %1312 = vrot.lane.b32.xlu1 %v1236_v51, %s1484_s29 }
 0x2e6   :  { %1367 = vrot.lane.b32.xlu0 %v1266_v50, %s1486_s8 }
 0x2e7   :  { %1322 = vrot.lane.b32.xlu1 %v1246_v42, %s1485_s30 }
 0x2ea   :  { %1377 = vrot.lane.b32.xlu0 %v1226_v47, %s1487_s9 }
 0x2eb   :  { %1332 = vrot.lane.b32.xlu1 %v1256_v34, %s1485_s30 }
 0x2ee   :  { %1387 = vrot.lane.b32.xlu0 %v1236_v51, %s1487_s9 }
 0x2ef   :  { %1342 = vrot.lane.b32.xlu1 %v1266_v50, %s1485_s30 }
 0x2f2   :  { %1397 = vrot.lane.b32.xlu0 %v1246_v42, %s1488_s10 }
 0x2f3   :  { %1352 = vrot.lane.b32.xlu1 %v1226_v47, %s1486_s8 }
 0x2f6   :  { %1407 = vrot.lane.b32.xlu0 %v1256_v34, %s1488_s10 }
 0x2f7   :  { %1362 = vrot.lane.b32.xlu1 %v1236_v51, %s1486_s8 }
 0x2fa   :  { %1417 = vrot.lane.b32.xlu0 %v1266_v50, %s1488_s10 }
 0x2fb   :  { %1372 = vrot.lane.b32.xlu1 %v1246_v42, %s1487_s9 }
 0x2ff   :  { %1382 = vrot.lane.b32.xlu1 %v1256_v34, %s1487_s9 }
 0x303   :  { %1392 = vrot.lane.b32.xlu1 %v1266_v50, %s1487_s9 }
 0x307   :  { %1402 = vrot.lane.b32.xlu1 %v1226_v47, %s1488_s10 }
 0x30b   :  { %1412 = vrot.lane.b32.xlu1 %v1236_v51, %s1488_s10 }
 0x328   :  { %v1248_v53 = vpop.permute.xlu0 %1247 }
 0x329   :  { %v1223_v30 = vpop.permute.xlu1 %1222  ;;  %v1250_v36 = vunpack.i.h.bf16 %v1248_v53  ;;  %v1249_v37 = vunpack.i.l.bf16 %v1248_v53 }
 0x32a   :  { %v1225_v55 = vunpack.i.h.bf16 %v1223_v30  ;;  %v1224_v49 = vunpack.i.l.bf16 %v1223_v30 }
 0x32c   :  { %v1258_v54 = vpop.permute.xlu0 %1257 }
 0x32d   :  { %v1228_v32 = vpop.permute.xlu1 %1227  ;;  %v1260_v20 = vunpack.i.h.bf16 %v1258_v54  ;;  %v1259_v24 = vunpack.i.l.bf16 %v1258_v54 }
 0x32e   :  { %v1230_v56 = vunpack.i.h.bf16 %v1228_v32  ;;  %v1229_v57 = vunpack.i.l.bf16 %v1228_v32 }
 0x32f   :  { %v472_v41 = vsel %vm464_vm6, %v1260_v20, %v1250_v36  ;;  %v471_v15 = vsel %vm464_vm6, %v1259_v24, %v1249_v37 }
 0x330   :  { %v1268_v58 = vpop.permute.xlu0 %1267  ;;  %v432_v60 = vsel %vm427_vm5, %v1224_v49, %v1229_v57  ;;  %v433_v6 = vsel %vm427_vm5, %v1225_v55, %v1230_v56  ;;  %v473_v44 = vpack.c.bf16 %v472_v41, %v471_v15 }
 0x331   :  { %v1233_v61 = vpop.permute.xlu1 %1232  ;;  %v437_v62 = vpack.c.bf16 %v433_v6, %v432_v60  ;;  %v1269_v45 = vunpack.i.l.bf16 %v1268_v58  ;;  %v1270_v47 = vunpack.i.h.bf16 %v1268_v58 }
 0x332   :  { %v1235_v21 = vunpack.i.h.bf16 %v1233_v61  ;;  %v1234_v63 = vunpack.i.l.bf16 %v1233_v61 }
 0x333   :  { %756 = vmatprep.subr.bf16.mxu1 %v437_v62 }
 0x334   :  { %v435_v0 = vsel %vm427_vm5, %v1235_v21, %v1225_v55  ;;  %v434_v1 = vsel %vm427_vm5, %v1234_v63, %v1224_v49  ;;  %v1684_v7 = vpop.permute.xlu0 %1277 }
 0x335   :  { %v436_v9 = vpack.c.bf16 %v435_v0, %v434_v1  ;;  %v1238_v10 = vpop.permute.xlu1 %1237  ;;  %v1280_v53 = vunpack.i.h.bf16 %v1684_v7  ;;  %v1279_v55 = vunpack.i.l.bf16 %v1684_v7 }
 0x336   :  { %v1240_v11 = vunpack.i.h.bf16 %v1238_v10  ;;  %v1239_v12 = vunpack.i.l.bf16 %v1238_v10 }
 0x337   :  { %757 = vmatpush1.bf16.msra.mxu1 %v436_v9 }
 0x338   :  { %v1686_v13 = vpop.permute.xlu0 %1287  ;;  %v431_v2 = vsel %vm427_vm5, %v1230_v56, %v1240_v11  ;;  %v430_v33 = vsel %vm427_vm5, %v1229_v57, %v1239_v12 }
 0x339   :  { %v1243_v16 = vpop.permute.xlu1 %1242  ;;  %v438_v39 = vpack.c.bf16 %v431_v2, %v430_v33  ;;  %v1290_v0 = vunpack.i.h.bf16 %v1686_v13  ;;  %v1289_v1 = vunpack.i.l.bf16 %v1686_v13 }
 0x33a   :  { %v1245_v17 = vunpack.i.h.bf16 %v1243_v16  ;;  %v1244_v18 = vunpack.i.l.bf16 %v1243_v16 }
 0x33b   :  { %v505_v20 = vsel %vm501_vm7, %v1280_v53, %v1290_v0 }
 0x33c   :  { %v1693_v3 = vpop.permute.xlu0 %1297  ;;  %v428_v35 = vsel %vm427_vm5, %v1239_v12, %v1244_v18  ;;  %v429_v5 = vsel %vm427_vm5, %v1240_v11, %v1245_v17  ;;  %v504_v18 = vsel %vm501_vm7, %v1279_v55, %v1289_v1 }
 0x33d   :  { %v1253_v4 = vpop.permute.xlu1 %1252  ;;  %v439_v38 = vpack.c.bf16 %v429_v5, %v428_v35  ;;  %v1300_v5 = vunpack.i.h.bf16 %v1693_v3 }
 0x33e   :  { %v1255_v40 = vunpack.i.h.bf16 %v1253_v4  ;;  %v1254_v14 = vunpack.i.l.bf16 %v1253_v4 }
 0x33f   :  { %799 = vmatprep.subr.bf16.mxu0 %v439_v38  ;;  %v512_v38 = vpack.c.bf16 %v505_v20, %v504_v18 }
 0x340   :  { %800 = vmatpush1.bf16.msra.mxu0 %v438_v39  ;;  %v1703_v19 = vpop.permute.xlu0 %1307  ;;  %v469_v31 = vsel %vm464_vm6, %v1249_v37, %v1254_v14  ;;  %v470_v42 = vsel %vm464_vm6, %v1250_v36, %v1255_v40  ;;  %v1299_v36 = vunpack.i.l.bf16 %v1693_v3 }
 0x341   :  { %v1263_v8 = vpop.permute.xlu1 %1262  ;;  %v474_v43 = vpack.c.bf16 %v470_v42, %v469_v31  ;;  %v1310_v13 = vunpack.i.h.bf16 %v1703_v19  ;;  %v1309_v24 = vunpack.i.l.bf16 %v1703_v19 }
 0x342   :  { %v1265_v46 = vunpack.i.h.bf16 %v1263_v8  ;;  %v1264_v34 = vunpack.i.l.bf16 %v1263_v8 }
 0x343   :  { %758 = vmatprep.subr.bf16.mxu1 %v474_v43  ;;  %v546_v41 = vsel %vm538_vm8, %v1310_v13, %v1300_v5 }
 0x344   :  { %v467_v48 = vsel %vm464_vm6, %v1254_v14, %v1264_v34  ;;  %v468_v50 = vsel %vm464_vm6, %v1255_v40, %v1265_v46  ;;  %759 = vmatpush1.bf16.msra.mxu1 %v473_v44  ;;  %v1713_v51 = vpop.permute.xlu0 %1317  ;;  %v465_v52 = vsel %vm464_vm6, %v1264_v34, %v1269_v45  ;;  %v466_v32 = vsel %vm464_vm6, %v1265_v46, %v1270_v47 }
 0x345   :  { %v475_v30 = vpack.c.bf16 %v468_v50, %v467_v48  ;;  %v1273_v54 = vpop.permute.xlu1 %1272  ;;  %v476_v57 = vpack.c.bf16 %v466_v32, %v465_v52  ;;  %v545_v14 = vsel %vm538_vm8, %v1309_v24, %v1299_v36  ;;  %v1319_v43 = vunpack.i.l.bf16 %v1713_v51 }
 0x346   :  { %v1275_v49 = vunpack.i.h.bf16 %v1273_v54  ;;  %v1274_v56 = vunpack.i.l.bf16 %v1273_v54  ;;  %v547_v8 = vpack.c.bf16 %v546_v41, %v545_v14  ;;  %v1320_v46 = vunpack.i.h.bf16 %v1713_v51 }
 0x347   :  { %801 = vmatprep.subr.bf16.mxu0 %v476_v57 }
 0x348   :  { %v1722_v58 = vpop.permute.xlu0 %1327  ;;  %v506_v60 = vsel %vm501_vm7, %v1274_v56, %v1279_v55  ;;  %v507_v6 = vsel %vm501_vm7, %v1275_v49, %v1280_v53  ;;  %802 = vmatpush1.bf16.msra.mxu0 %v475_v30 }
 0x349   :  { %v1283_v61 = vpop.permute.xlu1 %1282  ;;  %v511_v62 = vpack.c.bf16 %v507_v6, %v506_v60  ;;  %v1330_v50 = vunpack.i.h.bf16 %v1722_v58  ;;  %v1329_v51 = vunpack.i.l.bf16 %v1722_v58 }
 0x34a   :  { %v1285_v21 = vunpack.i.h.bf16 %v1283_v61  ;;  %v1284_v63 = vunpack.i.l.bf16 %v1283_v61 }
 0x34b   :  { %760 = vmatprep.subr.bf16.mxu1 %v511_v62 }
 0x34c   :  { %v508_v7 = vsel %vm501_vm7, %v1284_v63, %v1274_v56  ;;  %v509_v9 = vsel %vm501_vm7, %v1285_v21, %v1275_v49  ;;  %v1734_v10 = vpop.permute.xlu0 %1337 }
 0x34d   :  { %v510_v11 = vpack.c.bf16 %v509_v9, %v508_v7  ;;  %v1293_v12 = vpop.permute.xlu1 %1292  ;;  %v1340_v58 = vunpack.i.h.bf16 %v1734_v10  ;;  %v1339_v21 = vunpack.i.l.bf16 %v1734_v10 }
 0x34e   :  { %v1295_v16 = vunpack.i.h.bf16 %v1293_v12  ;;  %v1294_v17 = vunpack.i.l.bf16 %v1293_v12 }
 0x34f   :  { %761 = vmatpush1.bf16.msra.mxu1 %v510_v11 }
 0x350   :  { %v1743_v2 = vpop.permute.xlu0 %1347  ;;  %v502_v33 = vsel %vm501_vm7, %v1289_v1, %v1294_v17  ;;  %v503_v35 = vsel %vm501_vm7, %v1290_v0, %v1295_v16  ;;  %v578_v16 = vsel %vm575_vm9, %v1329_v51, %v1339_v21  ;;  %v579_v17 = vsel %vm575_vm9, %v1330_v50, %v1340_v58 }
 0x351   :  { %v1303_v37 = vpop.permute.xlu1 %1302  ;;  %v513_v4 = vpack.c.bf16 %v503_v35, %v502_v33  ;;  %v1350_v24 = vunpack.i.h.bf16 %v1743_v2  ;;  %v1349_v33 = vunpack.i.l.bf16 %v1743_v2 }
 0x352   :  { %v1305_v39 = vunpack.i.h.bf16 %v1303_v37  ;;  %v1304_v40 = vunpack.i.l.bf16 %v1303_v37 }
 0x353   :  { %803 = vmatprep.subr.bf16.mxu0 %v513_v4 }
 0x354   :  { %804 = vmatpush1.bf16.msra.mxu0 %v512_v38  ;;  %v543_v15 = vsel %vm538_vm8, %v1299_v36, %v1304_v40  ;;  %v544_v19 = vsel %vm538_vm8, %v1300_v5, %v1305_v39  ;;  %v1358_v3 = vpop.permute.xlu0 %1357  ;;  %v586_v36 = vpack.c.bf16 %v579_v17, %v578_v16 }
 0x355   :  { %v1313_v31 = vpop.permute.xlu1 %1312  ;;  %v548_v42 = vpack.c.bf16 %v544_v19, %v543_v15  ;;  %v1360_v10 = vunpack.i.h.bf16 %v1358_v3  ;;  %v1359_v18 = vunpack.i.l.bf16 %v1358_v3 }
 0x356   :  { %v1315_v44 = vunpack.i.h.bf16 %v1313_v31  ;;  %v1314_v45 = vunpack.i.l.bf16 %v1313_v31 }
 0x357   :  { %762 = vmatprep.subr.bf16.mxu1 %v548_v42  ;;  %v619_v38 = vsel %vm612_vm10, %v1359_v18, %v1349_v33 }
 0x358   :  { %v541_v34 = vsel %vm538_vm8, %v1304_v40, %v1314_v45  ;;  %v542_v47 = vsel %vm538_vm8, %v1305_v39, %v1315_v44  ;;  %763 = vmatpush1.bf16.msra.mxu1 %v547_v8  ;;  %v539_v48 = vsel %vm538_vm8, %v1314_v45, %v1319_v43  ;;  %v540_v30 = vsel %vm538_vm8, %v1315_v44, %v1320_v46  ;;  %v1368_v49 = vpop.permute.xlu0 %1367 }
 0x359   :  { %v549_v52 = vpack.c.bf16 %v542_v47, %v541_v34  ;;  %v1323_v53 = vpop.permute.xlu1 %1322  ;;  %v550_v55 = vpack.c.bf16 %v540_v30, %v539_v48  ;;  %v620_v39 = vsel %vm612_vm10, %v1360_v10, %v1350_v24  ;;  %v1369_v3 = vunpack.i.l.bf16 %v1368_v49 }
 0x35a   :  { %v1325_v54 = vunpack.i.h.bf16 %v1323_v53  ;;  %v1324_v32 = vunpack.i.l.bf16 %v1323_v53  ;;  %v621_v19 = vpack.c.bf16 %v620_v39, %v619_v38  ;;  %v1370_v8 = vunpack.i.h.bf16 %v1368_v49 }
 0x35b   :  { %805 = vmatprep.subr.bf16.mxu0 %v550_v55 }
 0x35c   :  { %v580_v56 = vsel %vm575_vm9, %v1324_v32, %v1329_v51  ;;  %v581_v57 = vsel %vm575_vm9, %v1325_v54, %v1330_v50  ;;  %806 = vmatpush1.bf16.msra.mxu0 %v549_v52  ;;  %v1782_v1 = vpop.permute.xlu0 %1377 }
 0x35d   :  { %v1333_v60 = vpop.permute.xlu1 %1332  ;;  %v585_v6 = vpack.c.bf16 %v581_v57, %v580_v56  ;;  %v1380_v46 = vunpack.i.h.bf16 %v1782_v1  ;;  %v1379_v52 = vunpack.i.l.bf16 %v1782_v1 }
 0x35e   :  { %v1335_v61 = vunpack.i.h.bf16 %v1333_v60  ;;  %v1334_v62 = vunpack.i.l.bf16 %v1333_v60 }
 0x35f   :  { %764 = vmatprep.subr.bf16.mxu1 %v585_v6 }
 0x360   :  { %v582_v63 = vsel %vm575_vm9, %v1334_v62, %v1324_v32  ;;  %v583_v0 = vsel %vm575_vm9, %v1335_v61, %v1325_v54  ;;  %v1388_v40 = vpop.permute.xlu0 %1387 }
 0x361   :  { %v584_v7 = vpack.c.bf16 %v583_v0, %v582_v63  ;;  %v1343_v9 = vpop.permute.xlu1 %1342  ;;  %v1390_v55 = vunpack.i.h.bf16 %v1388_v40  ;;  %v1389_v49 = vunpack.i.l.bf16 %v1388_v40 }
 0x362   :  { %v1345_v11 = vunpack.i.h.bf16 %v1343_v9  ;;  %v1344_v12 = vunpack.i.l.bf16 %v1343_v9 }
 0x363   :  { %765 = vmatpush1.bf16.msra.mxu1 %v584_v7  ;;  %v653_v63 = vsel %vm649_vm11, %v1380_v46, %v1390_v55 }
 0x364   :  { %v576_v20 = vsel %vm575_vm9, %v1339_v21, %v1344_v12  ;;  %v577_v13 = vsel %vm575_vm9, %v1340_v58, %v1345_v11  ;;  %v1398_v34 = vpop.permute.xlu0 %1397  ;;  %v652_v21 = vsel %vm649_vm11, %v1379_v52, %v1389_v49 }
 0x365   :  { %v1353_v35 = vpop.permute.xlu1 %1352  ;;  %v587_v5 = vpack.c.bf16 %v577_v13, %v576_v20  ;;  %v1400_v16 = vunpack.i.h.bf16 %v1398_v34  ;;  %v1399_v17 = vunpack.i.l.bf16 %v1398_v34  ;;  %v660_v20 = vpack.c.bf16 %v653_v63, %v652_v21 }
 0x366   :  { %v1355_v37 = vunpack.i.h.bf16 %v1353_v35  ;;  %v1354_v4 = vunpack.i.l.bf16 %v1353_v35 }
 0x367   :  { %807 = vmatprep.subr.bf16.mxu0 %v587_v5 }
 0x368   :  { %808 = vmatpush1.bf16.msra.mxu0 %v586_v36  ;;  %v617_v14 = vsel %vm612_vm10, %v1349_v33, %v1354_v4  ;;  %v618_v2 = vsel %vm612_vm10, %v1350_v24, %v1355_v37  ;;  %v1408_v61 = vpop.permute.xlu0 %1407 }
 0x369   :  { %v1363_v41 = vpop.permute.xlu1 %1362  ;;  %v622_v15 = vpack.c.bf16 %v618_v2, %v617_v14  ;;  %v1410_v7 = vunpack.i.h.bf16 %v1408_v61  ;;  %v1409_v9 = vunpack.i.l.bf16 %v1408_v61 }
 0x36a   :  { %v1365_v31 = vunpack.i.h.bf16 %v1363_v41  ;;  %v1364_v42 = vunpack.i.l.bf16 %v1363_v41 }
 0x36b   :  { %766 = vmatprep.subr.bf16.mxu1 %v622_v15  ;;  %v693_v33 = vsel %vm686_vm12, %v1409_v9, %v1399_v17  ;;  %v694_v35 = vsel %vm686_vm12, %v1410_v7, %v1400_v16 }
 0x36c   :  { %v615_v43 = vsel %vm612_vm10, %v1354_v4, %v1364_v42  ;;  %v616_v44 = vsel %vm612_vm10, %v1355_v37, %v1365_v31  ;;  %767 = vmatpush1.bf16.msra.mxu1 %v621_v19  ;;  %v613_v45 = vsel %vm612_vm10, %v1364_v42, %v1369_v3  ;;  %v614_v50 = vsel %vm612_vm10, %v1365_v31, %v1370_v8  ;;  %v1418_v37 = vpop.permute.xlu0 %1417  ;;  %v1443_v3 = vld [vmem:[%s1995_s2] ss:$8 sps:$4 sm:$0xff]  }
 0x36d   :  { %v623_v47 = vpack.c.bf16 %v616_v44, %v615_v43  ;;  %v1373_v48 = vpop.permute.xlu1 %1372  ;;  %v624_v51 = vpack.c.bf16 %v614_v50, %v613_v45  ;;  %v695_v39 = vpack.c.bf16 %v694_v35, %v693_v33  ;;  %v1420_v2 = vunpack.i.h.bf16 %v1418_v37 }
 0x36e   :  { %v1375_v53 = vunpack.i.h.bf16 %v1373_v48  ;;  %v1374_v30 = vunpack.i.l.bf16 %v1373_v48  ;;  %v1419_v41 = vunpack.i.l.bf16 %v1418_v37 }
 0x36f   :  { %809 = vmatprep.subr.bf16.mxu0 %v624_v51 }
 0x370   :  { %v654_v54 = vsel %vm649_vm11, %v1374_v30, %v1379_v52  ;;  %v655_v32 = vsel %vm649_vm11, %v1375_v53, %v1380_v46  ;;  %810 = vmatpush1.bf16.msra.mxu0 %v623_v47  ;;  %v1173_v46 = vld [vmem:[%s1997_s4 + $0x1] ss:$2 sm:$0xf]  ;;  %s1147_s4 = sshll.u32 %s1491_s15, 4  ;;  %s1148_s4 = int_to_ptr.vmem [resolvable:$true] %s1147_s4 }
 0x371   :  { %v1383_v56 = vpop.permute.xlu1 %1382  ;;  %v659_v57 = vpack.c.bf16 %v655_v32, %v654_v54  ;;  %v846_v34 = vrot.slane %v1173_v46, %v248_v23  ;;  %v850_v47 = vrot.slane %v1173_v46, %v252_v25  ;;  %v854_v52 = vrot.slane %v1173_v46, %v256_v26  ;;  %s1452_s16 = scalar_lea.vmem %s1148_s4, 32  ;;  %p1457_p1 = scmp.lt.s32.totalorder %s1148_s4, %s1148_s4 }
 0x372   :  { %v1385_v60 = vunpack.i.h.bf16 %v1383_v56  ;;  %v1384_v6 = vunpack.i.l.bf16 %v1383_v56  ;;  %v858_v51 = vrot.slane %v1173_v46, %v260_v27  ;;  %v1490_v46 = vmov 2   ;;  %p1453_p0 = scmp.ne.s32.totalorder %s1148_s4, %s1452_s16  ;;  %p1458_p2 = scmp.lt.s32.totalorder %s1452_s16, %s1452_s16 }
 0x373   :  { %768 = vmatprep.subr.bf16.mxu1 %v659_v57  ;;  %1421 = vset.pattern.permute.xlu0 %v1490_v46 }
 0x374   :  { %v656_v62 = vsel %vm649_vm11, %v1384_v6, %v1374_v30  ;;  %v657_v58 = vsel %vm649_vm11, %v1385_v60, %v1375_v53  ;;  %p1459_p3 = por %p1458_p2, %p1457_p1 }
 0x375   :  { %v658_v0 = vpack.c.bf16 %v657_v58, %v656_v62  ;;  %v1393_v1 = vpop.permute.xlu1 %1392 }
 0x376   :  { %v1395_v11 = vunpack.i.h.bf16 %v1393_v1  ;;  %v1394_v12 = vunpack.i.l.bf16 %v1393_v1  ;;  %p1460_p4 = pnand %p1459_p3, %p1453_p0 }
 0x377   :  { %769 = vmatpush1.bf16.msra.mxu1 %v658_v0 }
 0x378   :  { %v650_v10 = vsel %vm649_vm11, %v1389_v49, %v1394_v12  ;;  %v651_v18 = vsel %vm649_vm11, %v1390_v55, %v1395_v11 }
 0x379   :  { %v1403_v13 = vpop.permute.xlu1 %1402  ;;  %v661_v24 = vpack.c.bf16 %v651_v18, %v650_v10 }
 0x37a   :  { %v1405_v5 = vunpack.i.h.bf16 %v1403_v13  ;;  %v1404_v36 = vunpack.i.l.bf16 %v1403_v13 }
 0x37b   :  { %811 = vmatprep.subr.bf16.mxu0 %v661_v24 }
 0x37c   :  { %812 = vmatpush1.bf16.msra.mxu0 %v660_v20  ;;  %v691_v4 = vsel %vm686_vm12, %v1399_v17, %v1404_v36  ;;  %v692_v38 = vsel %vm686_vm12, %v1400_v16, %v1405_v5 }
 0x37d   :  { %v1413_v40 = vpop.permute.xlu1 %1412  ;;  %v696_v14 = vpack.c.bf16 %v692_v38, %v691_v4 }
 0x37e   :  { %v1415_v15 = vunpack.i.h.bf16 %v1413_v40  ;;  %v1414_v19 = vunpack.i.l.bf16 %v1413_v40 }
 0x37f   :  { %770 = vmatprep.subr.bf16.mxu1 %v696_v14 }
 0x380   :  { %v689_v31 = vsel %vm686_vm12, %v1404_v36, %v1414_v19  ;;  %v690_v42 = vsel %vm686_vm12, %v1405_v5, %v1415_v15  ;;  %771 = vmatpush1.bf16.msra.mxu1 %v695_v39  ;;  %v687_v8 = vsel %vm686_vm12, %v1414_v19, %v1419_v41  ;;  %v688_v43 = vsel %vm686_vm12, %v1415_v15, %v1420_v2 }
 0x381   :  { %v697_v44 = vpack.c.bf16 %v690_v42, %v689_v31  ;;  %v698_v45 = vpack.c.bf16 %v688_v43, %v687_v8 }
 0x383   :  { %787 = vmatmul.mubr.bf16.vlgmr.msra.gmra.mrb[4].mxu1 %v1443_v3  ;;  %813 = vmatprep.subr.bf16.mxu0 %v698_v45  ;;  %v1489_v45 = vmov 3  }
 0x384   :  { %814 = vmatpush1.bf16.msra.mxu0 %v697_v44  ;;  %1422 = vset.pattern.permute.xlu1 %v1489_v45 }
 0x387   :  { %830 = vmatmul.mubr.bf16.vlgmr.msra.gmra.mrb[8].mxu0 %v1443_v3 }
 0x456   :  { %v788_v48 = vpop.f32.mrb[4].mxu1 }
 0x457   :  { %v863_v50 = vmul.f32 %v846_v34, %v788_v48  ;;  %v790_v29 = vpop.f32.mrb[5].mxu1 }
 0x458   :  { %v864_v53 = vmul.f32 %v850_v47, %v790_v29  ;;  %v792_v30 = vpop.f32.mrb[6].mxu1 }
 0x459   :  { %v867_v54 = vmul.f32 %v846_v34, %v792_v30  ;;  %v794_v32 = vpop.f32.mrb[7].mxu1 }
 0x45a   :  { %v871_v55 = vadd.f32 %v864_v53, %v863_v50  ;;  %v868_v49 = vmul.f32 %v850_v47, %v794_v32  ;;  %v831_v56 = vpop.f32.mrb[8].mxu0 }
 0x45b   :  { %v865_v23 = vmul.f32 %v854_v52, %v831_v56  ;;  %v833_v57 = vpop.f32.mrb[9].mxu0 }
 0x45c   :  { %v876_v60 = vadd.f32 %v868_v49, %v867_v54  ;;  %v866_v25 = vmul.f32 %v858_v51, %v833_v57  ;;  %v835_v6 = vpop.f32.mrb[10].mxu0 }
 0x45d   :  { %v869_v61 = vmul.f32 %v854_v52, %v835_v6  ;;  %v837_v62 = vpop.f32.mrb[11].mxu0  ;;  %v872_v58 = vadd.f32 %v871_v55, %v865_v23 }
 0x45e   :  { %v870_v21 = vmul.f32 %v858_v51, %v837_v62 }
 0x45f   :  { %v873_v26 = vadd.f32 %v872_v58, %v866_v25  ;;  %v877_v63 = vadd.f32 %v876_v60, %v869_v61 }
 0x461   :  { %874 = vadd.xlane.f32.xlu1 %v873_v26  ;;  %v878_v0 = vadd.f32 %v877_v63, %v870_v21  ;;  %v974_v63 = vld [vmem:[%s1996_s3 + $0x10] sm:$0xff] }
 0x463   :  { %879 = vadd.xlane.f32.xlu0 %v878_v0 }
 0x4ee   :  { %v875_v22 = vpop.xlane.xlu1 %874 }
 0x4ef   :  { %v881_v27 = vmul.f32 0.0034722222, %v875_v22 }
 0x4f0   :  { %v880_v1 = vpop.xlane.xlu0 %879 }
 0x4f1   :  { %v883_v7 = vsub.f32 %v788_v48, %v881_v27  ;;  %v884_v9 = vsub.f32 %v790_v29, %v881_v27  ;;  %v885_v11 = vsub.f32 %v831_v56, %v881_v27  ;;  %v882_v12 = vmul.f32 0.0034722222, %v880_v1 }
 0x4f2   :  { %v886_v16 = vsub.f32 %v833_v57, %v881_v27 }
 0x4f3   :  { %v887_v17 = vsub.f32 %v792_v30, %v882_v12  ;;  %v888_v10 = vsub.f32 %v794_v32, %v882_v12  ;;  %v889_v18 = vsub.f32 %v835_v6, %v882_v12  ;;  %v891_v20 = vmul.f32 %v883_v7, %v883_v7 }
 0x4f4   :  { %v892_v13 = vmul.f32 %v884_v9, %v884_v9  ;;  %v893_v24 = vmul.f32 %v885_v11, %v885_v11  ;;  %v890_v33 = vsub.f32 %v837_v62, %v882_v12  ;;  %v894_v4 = vmul.f32 %v886_v16, %v886_v16  ;;  %v977_v12 = vld [vmem:[%s1996_s3 + $0x28] sm:$0xff] }
 0x4f5   :  { %v899_v35 = vmul.f32 %v891_v20, %v846_v34  ;;  %v895_v5 = vmul.f32 %v887_v17, %v887_v17  ;;  %v896_v36 = vmul.f32 %v888_v10, %v888_v10  ;;  %v897_v37 = vmul.f32 %v889_v18, %v889_v18 }
 0x4f6   :  { %v900_v38 = vmul.f32 %v892_v13, %v850_v47  ;;  %v898_v39 = vmul.f32 %v890_v33, %v890_v33  ;;  %v901_v2 = vmul.f32 %v893_v24, %v854_v52  ;;  %v902_v3 = vmul.f32 %v894_v4, %v858_v51  ;;  %v1179_v4 = vld [vmem:[%s1996_s3 + $0x68] sm:$0xff] }
 0x4f7   :  { %v903_v40 = vmul.f32 %v895_v5, %v846_v34  ;;  %v904_v14 = vmul.f32 %v896_v36, %v850_v47  ;;  %v905_v15 = vmul.f32 %v897_v37, %v854_v52  ;;  %v1174_v5 = vld [vmem:[%s1996_s3 + $0x40] sm:$0xff]  ;;  %v1175_v36 = vld [vmem:[%s1996_s3 + $0x48] sm:$0xff] }
 0x4f8   :  { %v907_v41 = vadd.f32 %v900_v38, %v899_v35  ;;  %v906_v42 = vmul.f32 %v898_v39, %v858_v51  ;;  %v1185_v35 = vld [vmem:[%s1996_s3 + $0x98] sm:$0xff]  ;;  %v1178_v37 = vld [vmem:[%s1996_s3 + $0x60] sm:$0xff]  ;;  %v1180_v38 = vld [vmem:[%s1996_s3 + $0x70] sm:$0xff] }
 0x4f9   :  { %v912_v19 = vadd.f32 %v904_v14, %v903_v40 }
 0x4fa   :  { %v908_v31 = vadd.f32 %v907_v41, %v901_v2  ;;  %v1181_v41 = vld [vmem:[%s1996_s3 + $0x78] sm:$0xff] }
 0x4fb   :  { %v913_v8 = vadd.f32 %v912_v19, %v905_v15  ;;  %v1186_v15 = vld [vmem:[%s1996_s3 + $0xa0] sm:$0xff] }
 0x4fc   :  { %v909_v43 = vadd.f32 %v908_v31, %v902_v3 }
 0x4fd   :  { %v914_v44 = vadd.f32 %v913_v8, %v906_v42  ;;  %v1187_v8 = vld [vmem:[%s1996_s3 + $0xa8] sm:$0xff] }
 0x4fe   :  { %910 = vadd.xlane.f32.xlu0 %v909_v43  ;;  %v1188_v43 = vld [vmem:[%s1996_s3 + $0xb0] sm:$0xff] }
 0x4ff   :  { %915 = vadd.xlane.f32.xlu1 %v914_v44  ;;  %v1189_v44 = vld [vmem:[%s1996_s3 + $0xb8] sm:$0xff] }
 0x510   :  { %947 = vperm.xlu1 %1422, %v1649_v28  }
 0x514   :  { %1423 = vset.pattern.permute.xlu1 %v1490_v46 }
 0x58b   :  { %v911_v34 = vpop.xlane.xlu0 %910 }
 0x58c   :  { %v917_v47 = vmul.f32 0.0034722222, %v911_v34  ;;  %v916_v48 = vpop.xlane.xlu1 %915 }
 0x58d   :  { %v918_v50 = vmul.f32 0.0034722222, %v916_v48 }
 0x58e   :  { %v919_v29 = vadd.f32 1e-05, %v917_v47 }
 0x58f   :  { %v920_v52 = vadd.f32 1e-05, %v918_v50 }
 0x590   :  { %1448 = vrsqrt.f32 %v919_v29  ;;  %v948_v32 = vpop.permute.xlu1 %947 }
 0x591   :  { %1450 = vrsqrt.f32 %v920_v52 }
 0x59a   :  { %v1449_v53 = vpop.eup %1448 }
 0x59b   :  { %v1451_v30 = vpop.eup %1450  ;;  %v925_v51 = vmul.f32 %v1449_v53, %v1649_v28 }
 0x59c   :  { %v926_v54 = vmul.f32 %v1451_v30, %v1657_v59 }
 0x59d   :  { %929 = vperm.xlu0 %1421, %v925_v51  }
 0x59e   :  { %934 = vperm.xlu1 %1423, %v926_v54  }
 0x5a1   :  { %1425 = vset.pattern.permute.xlu0 %v1489_v45 }
 0x5a2   :  { %1424 = vset.pattern.permute.xlu1 %v1489_v45 }
 0x5a3   :  { %952 = vperm.xlu1 %1424, %v1657_v59   ;;  %v975_v59 = vld [vmem:[%s1996_s3 + $0x18] sm:$0xff] }
 0x61c   :  { %v930_v55 = vpop.permute.xlu0 %929 }
 0x61d   :  { %v937_v49 = vmul.f32 %v930_v55, %v883_v7  ;;  %v938_v56 = vmul.f32 %v930_v55, %v884_v9  ;;  %v939_v23 = vmul.f32 %v930_v55, %v885_v11  ;;  %v940_v57 = vmul.f32 %v930_v55, %v886_v16  ;;  %v935_v60 = vpop.permute.xlu1 %934  ;;  %v972_v7 = vld [vmem:[%s1996_s3] sm:$0xff]  ;;  %v973_v9 = vld [vmem:[%s1996_s3 + $0x8] sm:$0xff]  ;;  %v978_v16 = vld [vmem:[%s1996_s3 + $0x30] sm:$0xff] }
 0x61e   :  { %v941_v28 = vmul.f32 %v935_v60, %v887_v17  ;;  %v942_v58 = vmul.f32 %v935_v60, %v888_v10  ;;  %v943_v21 = vmul.f32 %v935_v60, %v889_v18  ;;  %v944_v26 = vmul.f32 %v935_v60, %v890_v33  ;;  %v976_v11 = vld [vmem:[%s1996_s3 + $0x20] sm:$0xff]  ;;  %v979_v17 = vld [vmem:[%s1996_s3 + $0x38] sm:$0xff]  ;;  %v1184_v18 = vld [vmem:[%s1996_s3 + $0x90] sm:$0xff] }
 0x61f   :  { %v955_v25 = vadd.f32 %v948_v32, %v937_v49  ;;  %v956_v6 = vadd.f32 %v948_v32, %v938_v56  ;;  %v957_v61 = vadd.f32 %v948_v32, %v939_v23  ;;  %v958_v62 = vadd.f32 %v948_v32, %v940_v57 }
 0x621   :  { %v1871_v0 = vmax.f32 %v955_v25, 0.0  ;;  %v1873_v22 = vmax.f32 %v956_v6, 0.0  ;;  %v1875_v27 = vmax.f32 %v957_v61, 0.0  ;;  %v1877_v1 = vmax.f32 %v958_v62, 0.0 }
 0x622   :  { %v953_v10 = vpop.permute.xlu1 %952 }
 0x623   :  { %v959_v20 = vadd.f32 %v953_v10, %v941_v28  ;;  %v960_v13 = vadd.f32 %v953_v10, %v942_v58  ;;  %v961_v24 = vadd.f32 %v953_v10, %v943_v21  ;;  %v962_v33 = vadd.f32 %v953_v10, %v944_v26 }
 0x624   :  { %v982_v39 = vmul.f32 %v974_v63, %v1875_v27  ;;  %v983_v40 = vmul.f32 %v975_v59, %v1877_v1  ;;  %v980_v14 = vmul.f32 %v972_v7, %v1871_v0  ;;  %v981_v2 = vmul.f32 %v973_v9, %v1873_v22 }
 0x625   :  { %v967_v19 = vmax.f32 %v959_v20, 0.0  ;;  %v968_v3 = vmax.f32 %v960_v13, 0.0  ;;  %v969_v31 = vmax.f32 %v961_v24, 0.0  ;;  %v970_v42 = vmax.f32 %v962_v33, 0.0 }
 0x626   :  { %v1094_v45 = vmul.f32 %v1184_v18, %v1875_v27  ;;  %v1095_v46 = vmul.f32 %v1185_v35, %v1877_v1  ;;  %v1036_v34 = vmul.f32 %v1174_v5, %v1871_v0  ;;  %v1037_v47 = vmul.f32 %v1175_v36, %v1873_v22 }
 0x627   :  { %v984_v48 = vmul.f32 %v976_v11, %v967_v19  ;;  %v985_v50 = vmul.f32 %v977_v12, %v968_v3  ;;  %v986_v29 = vmul.f32 %v978_v16, %v969_v31  ;;  %v987_v52 = vmul.f32 %v979_v17, %v970_v42 }
 0x628   :  { %v1040_v53 = vmul.f32 %v1178_v37, %v967_v19  ;;  %v1041_v30 = vmul.f32 %v1179_v4, %v968_v3  ;;  %v1941_v51 = vmul.f32 %v1180_v38, %v969_v31  ;;  %v1943_v54 = vmul.f32 %v1181_v41, %v970_v42 }
 0x629   :  { %v1945_v32 = vmul.f32 %v1186_v15, %v967_v19  ;;  %v1947_v55 = vmul.f32 %v1187_v8, %v968_v3  ;;  %v1098_v49 = vmul.f32 %v1188_v43, %v969_v31  ;;  %v1099_v56 = vmul.f32 %v1189_v44, %v970_v42 }
 0x62a   :  { %v1002_v23 = vadd.f32 %v986_v29, %v982_v39  ;;  %v1009_v57 = vadd.f32 %v987_v52, %v983_v40  ;;  %v988_v60 = vadd.f32 %v984_v48, %v980_v14  ;;  %v995_v25 = vadd.f32 %v985_v50, %v981_v2  ;;  %v1176_v48 = vld [vmem:[%s1996_s3 + $0x50] sm:$0xff]  ;;  %v1177_v50 = vld [vmem:[%s1996_s3 + $0x58] sm:$0xff] }
 0x62b   :  { %v1114_v6 = vadd.f32 %v1098_v49, %v1094_v45  ;;  %v1121_v61 = vadd.f32 %v1099_v56, %v1095_v46  ;;  %v1044_v62 = vadd.f32 %v1040_v53, %v1036_v34  ;;  %v1051_v28 = vadd.f32 %v1041_v30, %v1037_v47  ;;  %v1182_v49 = vld [vmem:[%s1996_s3 + $0x80] sm:$0xff]  ;;  %v1183_v56 = vld [vmem:[%s1996_s3 + $0x88] sm:$0xff] }
 0x62c   :  { %v1003_v58 = vrot.slane %v1002_v23, 4  ;;  %v1010_v21 = vrot.slane %v1009_v57, 4  ;;  %v989_v26 = vrot.slane %v988_v60, 4  ;;  %v996_v63 = vrot.slane %v995_v25, 4 }
 0x62d   :  { %v1115_v59 = vrot.slane %v1114_v6, 4  ;;  %v1122_v7 = vrot.slane %v1121_v61, 4  ;;  %v1045_v9 = vrot.slane %v1044_v62, 4  ;;  %v1052_v11 = vrot.slane %v1051_v28, 4 }
 0x62e   :  { %v1004_v12 = vadd.f32 %v1003_v58, %v1002_v23  ;;  %v1011_v16 = vadd.f32 %v1010_v21, %v1009_v57  ;;  %v990_v17 = vadd.f32 %v989_v26, %v988_v60  ;;  %v997_v10 = vadd.f32 %v996_v63, %v995_v25 }
 0x62f   :  { %v1116_v18 = vadd.f32 %v1115_v59, %v1114_v6  ;;  %v1123_v20 = vadd.f32 %v1122_v7, %v1121_v61  ;;  %v1046_v13 = vadd.f32 %v1045_v9, %v1044_v62  ;;  %v1053_v24 = vadd.f32 %v1052_v11, %v1051_v28 }
 0x630   :  { %v1005_v33 = vrot.slane %v1004_v12, 2  ;;  %v1012_v35 = vrot.slane %v1011_v16, 2  ;;  %v991_v5 = vrot.slane %v990_v17, 2  ;;  %v998_v36 = vrot.slane %v997_v10, 2 }
 0x631   :  { %v1117_v37 = vrot.slane %v1116_v18, 2  ;;  %v1124_v4 = vrot.slane %v1123_v20, 2  ;;  %v1047_v38 = vrot.slane %v1046_v13, 2  ;;  %v1054_v39 = vrot.slane %v1053_v24, 2 }
 0x632   :  { %v1006_v40 = vadd.f32 %v1005_v33, %v1004_v12  ;;  %v1013_v14 = vadd.f32 %v1012_v35, %v1011_v16  ;;  %v992_v2 = vadd.f32 %v991_v5, %v990_v17  ;;  %v999_v41 = vadd.f32 %v998_v36, %v997_v10 }
 0x633   :  { %v1118_v15 = vadd.f32 %v1117_v37, %v1116_v18  ;;  %v1125_v19 = vadd.f32 %v1124_v4, %v1123_v20  ;;  %v1048_v3 = vadd.f32 %v1047_v38, %v1046_v13  ;;  %v1055_v31 = vadd.f32 %v1054_v39, %v1053_v24 }
 0x634   :  { %v1007_v42 = vrot.slane %v1006_v40, 1  ;;  %v1014_v8 = vrot.slane %v1013_v14, 1  ;;  %v993_v43 = vrot.slane %v992_v2, 1  ;;  %v1000_v44 = vrot.slane %v999_v41, 1 }
 0x635   :  { %v1119_v45 = vrot.slane %v1118_v15, 1  ;;  %v1126_v46 = vrot.slane %v1125_v19, 1  ;;  %v1049_v34 = vrot.slane %v1048_v3, 1  ;;  %v1056_v47 = vrot.slane %v1055_v31, 1 }
 0x636   :  { %v1008_v29 = vadd.f32 %v1007_v42, %v1006_v40  ;;  %v1015_v52 = vadd.f32 %v1014_v8, %v1013_v14  ;;  %v994_v53 = vadd.f32 %v993_v43, %v992_v2  ;;  %v1001_v30 = vadd.f32 %v1000_v44, %v999_v41  ;;  %v1016_v41 = vld [vmem:[%s1999_s6 + $0x1] sm:$0x1]  ;;  %v1072_v42 = vld [vmem:[%s1999_s6 + $0x2] sm:$0x1]  ;;  %v1128_v43 = vld [vmem:[%s1999_s6 + $0x3] sm:$0x1] }
 0x637   :  { %v1120_v23 = vadd.f32 %v1119_v45, %v1118_v15  ;;  %v1127_v57 = vadd.f32 %v1126_v46, %v1125_v19  ;;  %v1050_v60 = vadd.f32 %v1049_v34, %v1048_v3  ;;  %v1057_v25 = vadd.f32 %v1056_v47, %v1055_v31  ;;  %v971_v31 = vld [vmem:[%s1999_s6] sm:$0x1] }
 0x638   :  { %v1022_v6 = vadd.f32 %v1015_v52, %v1008_v29  ;;  %v1017_v61 = vadd.f32 %v1001_v30, %v994_v53  ;;  %v1038_v62 = vmul.f32 %v1176_v48, %v1875_v27  ;;  %v1039_v28 = vmul.f32 %v1177_v50, %v1877_v1 }
 0x639   :  { %v1092_v58 = vmul.f32 %v1182_v49, %v1871_v0  ;;  %v1093_v21 = vmul.f32 %v1183_v56, %v1873_v22  ;;  %v1134_v9 = vadd.f32 %v1127_v57, %v1120_v23  ;;  %v1073_v11 = vadd.f32 %v1057_v25, %v1050_v60 }
 0x63a   :  { %1023 = vadd.xlane.f32.xlu0 %v1022_v6  ;;  %1018 = vadd.xlane.f32.xlu1 %v1017_v61  ;;  %v1058_v26 = vadd.f32 %v1941_v51, %v1038_v62  ;;  %v1065_v63 = vadd.f32 %v1943_v54, %v1039_v28 }
 0x63b   :  { %v1100_v59 = vadd.f32 %v1945_v32, %v1092_v58  ;;  %v1107_v7 = vadd.f32 %v1947_v55, %v1093_v21 }
 0x63c   :  { %v1059_v12 = vrot.slane %v1058_v26, 4  ;;  %v1066_v27 = vrot.slane %v1065_v63, 4 }
 0x63d   :  { %v1101_v16 = vrot.slane %v1100_v59, 4  ;;  %v1108_v1 = vrot.slane %v1107_v7, 4 }
 0x63e   :  { %1135 = vadd.xlane.f32.xlu0 %v1134_v9  ;;  %1074 = vadd.xlane.f32.xlu1 %v1073_v11  ;;  %v1060_v0 = vadd.f32 %v1059_v12, %v1058_v26  ;;  %v1067_v22 = vadd.f32 %v1066_v27, %v1065_v63 }
 0x63f   :  { %v1102_v17 = vadd.f32 %v1101_v16, %v1100_v59  ;;  %v1109_v10 = vadd.f32 %v1108_v1, %v1107_v7 }
 0x640   :  { %v1061_v18 = vrot.slane %v1060_v0, 2  ;;  %v1068_v51 = vrot.slane %v1067_v22, 2 }
 0x641   :  { %v1103_v20 = vrot.slane %v1102_v17, 2  ;;  %v1110_v54 = vrot.slane %v1109_v10, 2 }
 0x642   :  { %v1062_v13 = vadd.f32 %v1061_v18, %v1060_v0  ;;  %v1069_v32 = vadd.f32 %v1068_v51, %v1067_v22 }
 0x643   :  { %v1104_v24 = vadd.f32 %v1103_v20, %v1102_v17  ;;  %v1111_v55 = vadd.f32 %v1110_v54, %v1109_v10 }
 0x644   :  { %v1063_v33 = vrot.slane %v1062_v13, 1  ;;  %v1070_v35 = vrot.slane %v1069_v32, 1 }
 0x645   :  { %v1105_v5 = vrot.slane %v1104_v24, 1  ;;  %v1112_v36 = vrot.slane %v1111_v55, 1 }
 0x646   :  { %v1064_v37 = vadd.f32 %v1063_v33, %v1062_v13  ;;  %v1071_v4 = vadd.f32 %v1070_v35, %v1069_v32 }
 0x647   :  { %v1106_v39 = vadd.f32 %v1105_v5, %v1104_v24  ;;  %v1113_v40 = vadd.f32 %v1112_v36, %v1111_v55 }
 0x648   :  { %v1078_v38 = vadd.f32 %v1071_v4, %v1064_v37 }
 0x649   :  { %v1129_v14 = vadd.f32 %v1113_v40, %v1106_v39 }
 0x64a   :  { %1079 = vadd.xlane.f32.xlu1 %v1078_v38 }
 0x64e   :  { %1130 = vadd.xlane.f32.xlu1 %v1129_v14 }
 0x6c7   :  { %v1019_v2 = vpop.xlane.xlu1 %1018  ;;  %v1024_v15 = vpop.xlane.xlu0 %1023 }
 0x6c8   :  { %v1025_v3 = vmul.f32 %v1024_v15, %v1016_v41  ;;  %v1020_v8 = vmul.f32 %v1019_v2, %v1016_v41 }
 0x6ca   :  { %v1026_v46 = vadd.f32 %v1025_v3, %v971_v31  ;;  %v1021_v48 = vadd.f32 %v1020_v8, %v971_v31 }
 0x6cb   :  { %v1075_v19 = vpop.xlane.xlu1 %1074  ;;  %v1136_v44 = vpop.xlane.xlu0 %1135 }
 0x6cc   :  { %v1076_v34 = vmul.f32 %v1075_v19, %v1072_v42  ;;  %v1137_v50 = vmul.f32 %v1136_v44, %v1128_v43 }
 0x6ce   :  { %v1077_v53 = vadd.f32 %v1076_v34, %v1021_v48 }
 0x6d7   :  { %v1080_v45 = vpop.xlane.xlu1 %1079 }
 0x6d8   :  { %v1081_v47 = vmul.f32 %v1080_v45, %v1072_v42 }
 0x6da   :  { %v1082_v29 = vadd.f32 %v1081_v47, %v1026_v46 }
 0x6db   :  { %v1131_v52 = vpop.xlane.xlu1 %1130 }
 0x6dc   :  { %v1132_v30 = vmul.f32 %v1131_v52, %v1128_v43  ;;  %v1138_v49 = vadd.f32 %v1137_v50, %v1082_v29 }
 0x6de   :  { %v1133_v56 = vadd.f32 %v1132_v30, %v1077_v53  ;;  %1140 = vst [vmem:[#allocation3 + $0x1] sm:$0x1] %v1138_v49 }
 0x6e0   :  { %1139 = vst [vmem:[#allocation3] sm:$0x1] %v1133_v56 }
 0x6e1   :  { %1463 = shalt.err (!%p1460_p4)
}
 0x6e2   :  { %s1464_s18 = scalar_lea.hbm %s2000_s7, 32 }
 0x6e3   :  { %p1465_p5 = scmp.ne.s32.totalorder %s2000_s7, %s1464_s18  ;;  %p1468_p6 = scmp.lt.u32.totalorder %s1464_s18, %s2000_s7 }
 0x6e5   :  { %p1470_p7 = pnand %p1468_p6, %p1465_p5 }
 0x6e7   :  { %1473 = shalt.err (!%p1470_p7)
}
 0x6e8   :  { %1150 = dma.vmem_to_hbm [thread:$0]  %s1148_s4, 32, %s2000_s7, [#allocation4]  }
 0x6e9   :  { %1474 = dma.done.wait [#allocation4], 32  }
 0x6ea   :  { %1475 = vsyncadd [#allocation4], 4294967264 }
 0x6eb   :  { %1154 = vsyncpa [#allocation4], 1 }

</bundles_post_ra>
